<compile_context>
chip_gen: v6e
topology: v6e:2x2x1
jax: 0.10.0
libtpu: 0.0.40
codegen_flags: <defaults>
</compile_context>

<pallas_src>
import functools
import math

import jax
import jax.numpy as jnp
from jax.experimental import pallas as pl
from jax.experimental.pallas import tpu as pltpu

# ---- scaled-down config (real model: hidden=768, layers=12, heads=12) ----
VOCAB = 64
HIDDEN = 32
N_LAYERS = 2
N_HEADS = 4
HEAD_DIM = HIDDEN // N_HEADS
INTERMEDIATE = 64
MAX_POS = 40
N_CLASSES = 9
CLS_PAD = 128          # lane-dense classifier output, sliced to N_CLASSES in JAX
PAD_IDX = 1
LN_EPS = 1e-5


# ---------------- in-kernel helpers ----------------

def _ln(v, g, b, eps):
    mu = jnp.mean(v, axis=-1, keepdims=True)
    var = jnp.mean(jnp.square(v - mu), axis=-1, keepdims=True)
    return (v - mu) * jax.lax.rsqrt(var + eps) * g + b


def _gelu(v):
    # TODO(synk): HF RoBERTa uses exact (erf) GELU; tanh approximation used
    # here for robust Mosaic lowering.
    return 0.5 * v * (1.0 + jnp.tanh(0.7978845608028654 * (v + 0.044715 * v * v * v)))


# ---------------- Pallas kernels ----------------

def _ln_kernel(x_ref, g_ref, b_ref, o_ref, *, eps):
    o_ref[...] = _ln(x_ref[...], g_ref[...], b_ref[...], eps)


def layer_norm(x, gamma, beta, eps=LN_EPS):
    M, H = x.shape
    return pl.pallas_call(
        functools.partial(_ln_kernel, eps=eps),
        out_shape=jax.ShapeDtypeStruct((M, H), jnp.float32),
        grid=(1,),
        in_specs=[pl.BlockSpec((M, H), lambda i: (0, 0)),
                  pl.BlockSpec((1, H), lambda i: (0, 0)),
                  pl.BlockSpec((1, H), lambda i: (0, 0))],
        out_specs=pl.BlockSpec((M, H), lambda i: (0, 0)),
    )(x, gamma.reshape(1, H), beta.reshape(1, H))


def _encoder_layer_kernel(x_ref, bias_ref, wqkv_ref, bqkv_ref, wo_ref, bo_ref,
                          ln1g_ref, ln1b_ref, w1_ref, b1_ref, w2_ref, b2_ref,
                          ln2g_ref, ln2b_ref, o_ref, *, n_heads, head_dim, eps):
    x = x_ref[0]                       # (S, H) f32 activations for this batch
    neg = bias_ref[0]                  # (1, S) f32 additive key mask (-1e9 on pads)
    hid = x.shape[-1]
    scale = 1.0 / math.sqrt(head_dim)

    # --- fused QKV projection: one (S,H)x(H,3H) bf16 matmul, f32 accumulation ---
    qkv = jnp.dot(x.astype(jnp.bfloat16), wqkv_ref[...],
                  preferred_element_type=jnp.float32) + bqkv_ref[...]     # (S, 3H)
    qkv16 = qkv.astype(jnp.bfloat16)
    wo = wo_ref[...]                   # (H, H) bf16

    # --- multi-head attention, all heads for this batch in one grid step;
    #     output projection accumulated per head (merge-heads fused away) ---
    attn = jnp.zeros_like(x)
    for h in range(n_heads):
        q = qkv16[:, h * head_dim:(h + 1) * head_dim]                    # (S, D)
        k = qkv16[:, hid + h * head_dim: hid + (h + 1) * head_dim]       # (S, D)
        v = qkv16[:, 2 * hid + h * head_dim: 2 * hid + (h + 1) * head_dim]
        # scores = q @ k^T (contract head_dim; no explicit transpose)
        s = jax.lax.dot_general(q, k, (((1,), (1,)), ((), ())),
                                preferred_element_type=jnp.float32)      # (S, S)
        s = s * scale + neg
        m = jnp.max(s, axis=-1, keepdims=True)
        p = jnp.exp(s - m)
        p = p * pl.reciprocal(jnp.sum(p, axis=-1, keepdims=True), approx=True)
        ctx = jnp.dot(p.astype(jnp.bfloat16), v,
                      preferred_element_type=jnp.float32)                # (S, D)
        attn = attn + jnp.dot(ctx.astype(jnp.bfloat16),
                              wo[h * head_dim:(h + 1) * head_dim, :],
                              preferred_element_type=jnp.float32)        # (S, H)
    attn = attn + bo_ref[...]

    # --- residual + LayerNorm 1 (fused) ---
    h1 = _ln(attn + x, ln1g_ref[...], ln1b_ref[...], eps)

    # --- FFN (fused): gelu(h1 @ w1 + b1) @ w2 + b2, residual + LayerNorm 2 ---
    ff = jnp.dot(h1.astype(jnp.bfloat16), w1_ref[...],
                 preferred_element_type=jnp.float32) + b1_ref[...]
    ff = _gelu(ff)
    ff = jnp.dot(ff.astype(jnp.bfloat16), w2_ref[...],
                 preferred_element_type=jnp.float32) + b2_ref[...]
    o_ref[0] = _ln(ff + h1, ln2g_ref[...], ln2b_ref[...], eps)


def encoder_layer(x, neg_bias, l):
    B, S, H = x.shape
    I = l["w1"].shape[1]
    full = lambda b: (0, 0)
    return pl.pallas_call(
        functools.partial(_encoder_layer_kernel,
                          n_heads=N_HEADS, head_dim=HEAD_DIM, eps=LN_EPS),
        out_shape=jax.ShapeDtypeStruct((B, S, H), jnp.float32),
        grid=(B,),
        in_specs=[pl.BlockSpec((1, S, H), lambda b: (b, 0, 0)),
                  pl.BlockSpec((1, 1, S), lambda b: (b, 0, 0)),
                  pl.BlockSpec((H, 3 * H), full),
                  pl.BlockSpec((1, 3 * H), full),
                  pl.BlockSpec((H, H), full),
                  pl.BlockSpec((1, H), full),
                  pl.BlockSpec((1, H), full),
                  pl.BlockSpec((1, H), full),
                  pl.BlockSpec((H, I), full),
                  pl.BlockSpec((1, I), full),
                  pl.BlockSpec((I, H), full),
                  pl.BlockSpec((1, H), full),
                  pl.BlockSpec((1, H), full),
                  pl.BlockSpec((1, H), full)],
        out_specs=pl.BlockSpec((1, S, H), lambda b: (b, 0, 0)),
        compiler_params=pltpu.CompilerParams(dimension_semantics=("parallel",)),
    )(x, neg_bias,
      l["wqkv"], l["bqkv"].reshape(1, 3 * H),
      l["wo"], l["bo"].reshape(1, H),
      l["ln1_g"].reshape(1, H), l["ln1_b"].reshape(1, H),
      l["w1"], l["b1"].reshape(1, I),
      l["w2"], l["b2"].reshape(1, H),
      l["ln2_g"].reshape(1, H), l["ln2_b"].reshape(1, H))


def _head_kernel(x_ref, pw_ref, pb_ref, cw_ref, cb_ref, o_ref):
    x = x_ref[...]                                      # (B, H) f32 CLS tokens
    pooled = jnp.tanh(jnp.dot(x.astype(jnp.bfloat16), pw_ref[...],
                              preferred_element_type=jnp.float32) + pb_ref[...])
    # dropout(p=0.5) is identity at inference time
    logits = jnp.dot(pooled.astype(jnp.bfloat16), cw_ref[...],
                     preferred_element_type=jnp.float32) + cb_ref[...]
    o_ref[...] = jnp.maximum(logits, 0.0)               # final ReLU head


def pooler_classifier(cls_tok, pool_w, pool_b, cls_w, cls_b):
    B, H = cls_tok.shape
    NP = cls_w.shape[1]
    return pl.pallas_call(
        _head_kernel,
        out_shape=jax.ShapeDtypeStruct((B, NP), jnp.float32),
        grid=(1,),
        in_specs=[pl.BlockSpec((B, H), lambda i: (0, 0)),
                  pl.BlockSpec((H, H), lambda i: (0, 0)),
                  pl.BlockSpec((1, H), lambda i: (0, 0)),
                  pl.BlockSpec((H, NP), lambda i: (0, 0)),
                  pl.BlockSpec((1, NP), lambda i: (0, 0))],
        out_specs=pl.BlockSpec((B, NP), lambda i: (0, 0)),
    )(cls_tok, pool_w, pool_b.reshape(1, H), cls_w, cls_b.reshape(1, NP))


# ---------------- parameters ----------------

def init_params(key):
    def nrm(k, shape):
        return jax.random.normal(k, shape, jnp.float32) * 0.02
    keys = iter(jax.random.split(key, 64))
    p = {
        "word_emb": nrm(next(keys), (VOCAB, HIDDEN)),
        "pos_emb": nrm(next(keys), (MAX_POS, HIDDEN)),
        "tok_emb": nrm(next(keys), (1, HIDDEN)),
        "emb_ln_g": jnp.ones((HIDDEN,), jnp.float32),
        "emb_ln_b": jnp.zeros((HIDDEN,), jnp.float32),
        "layers": [],
    }
    for _ in range(N_LAYERS):
        l = {}
        wq = nrm(next(keys), (HIDDEN, HIDDEN))
        wk = nrm(next(keys), (HIDDEN, HIDDEN))
        wv = nrm(next(keys), (HIDDEN, HIDDEN))
        l["wqkv"] = jnp.concatenate([wq, wk, wv], axis=1).astype(jnp.bfloat16)
        l["bqkv"] = jnp.zeros((3 * HIDDEN,), jnp.float32)
        l["wo"] = nrm(next(keys), (HIDDEN, HIDDEN)).astype(jnp.bfloat16)
        l["bo"] = jnp.zeros((HIDDEN,), jnp.float32)
        l["ln1_g"] = jnp.ones((HIDDEN,), jnp.float32)
        l["ln1_b"] = jnp.zeros((HIDDEN,), jnp.float32)
        l["w1"] = nrm(next(keys), (HIDDEN, INTERMEDIATE)).astype(jnp.bfloat16)
        l["b1"] = jnp.zeros((INTERMEDIATE,), jnp.float32)
        l["w2"] = nrm(next(keys), (INTERMEDIATE, HIDDEN)).astype(jnp.bfloat16)
        l["b2"] = jnp.zeros((HIDDEN,), jnp.float32)
        l["ln2_g"] = jnp.ones((HIDDEN,), jnp.float32)
        l["ln2_b"] = jnp.zeros((HIDDEN,), jnp.float32)
        p["layers"].append(l)
    p["pool_w"] = nrm(next(keys), (HIDDEN, HIDDEN)).astype(jnp.bfloat16)
    p["pool_b"] = jnp.zeros((HIDDEN,), jnp.float32)
    cls_w = jnp.zeros((HIDDEN, CLS_PAD), jnp.float32)
    cls_w = cls_w.at[:, :N_CLASSES].set(nrm(next(keys), (HIDDEN, N_CLASSES)))
    p["cls_w"] = cls_w.astype(jnp.bfloat16)              # lane-dense padded head
    p["cls_b"] = jnp.zeros((CLS_PAD,), jnp.float32)
    return p


# ---------------- forward (BertClassifier.forward) ----------------

def bert_classifier_forward(params, input_id, mask):
    B, S = input_id.shape
    mask_f = mask.astype(jnp.float32)

    # RoBERTa-style position ids (pads map to padding_idx)
    pos_ids = jnp.cumsum(mask, axis=1) * mask + PAD_IDX

    # embeddings (gather is glue) + LayerNorm (Pallas, no zero residual)
    x = (params["word_emb"][input_id]
         + params["pos_emb"][pos_ids]
         + params["tok_emb"][0]).astype(jnp.float32)
    x = layer_norm(x.reshape(B * S, HIDDEN),
                   params["emb_ln_g"], params["emb_ln_b"]).reshape(B, S, HIDDEN)

    # additive key mask as a tiny (B, 1, S) row; expanded in-kernel only
    neg_bias = ((1.0 - mask_f) * -1e9)[:, None, :]

    for l in params["layers"]:
        x = encoder_layer(x, neg_bias, l)

    # pooler: tanh(W_p * h[:, 0] + b_p) -> classifier: relu(Linear(hidden -> 9))
    cls_tok = x[:, 0, :]
    logits = pooler_classifier(cls_tok, params["pool_w"], params["pool_b"],
                               params["cls_w"], params["cls_b"])
    return logits[:, :N_CLASSES]


if __name__ == "__main__":
    key = jax.random.PRNGKey(0)
    pkey, ikey = jax.random.split(key)
    params = init_params(pkey)

    B, S = 2, 8
    input_id = jax.random.randint(ikey, (B, S), 2, VOCAB, dtype=jnp.int32)
    mask = jnp.ones((B, S), dtype=jnp.int32).at[1, 6:].set(0)  # second row padded

    fwd = jax.jit(bert_classifier_forward)
    out = fwd(params, input_id, mask)
    jax.block_until_ready(out)
    assert out.shape == (B, N_CLASSES) and out.dtype == jnp.float32
    assert bool(jnp.all(out >= 0.0))  # relu output
    print("KERNEL_OK")
</pallas_src>

<mosaic_0001>
module attributes {stable_mosaic.version = 11 : i64} {
  func.func @_ln_kernel(%arg0: i32, %arg1: memref<16x32xf32, #tpu.memory_space<vmem>>, %arg2: memref<1x32xf32, #tpu.memory_space<vmem>>, %arg3: memref<1x32xf32, #tpu.memory_space<vmem>>, %arg4: memref<16x32xf32, #tpu.memory_space<vmem>>) attributes {dimension_semantics = [#tpu.dimension_semantics<arbitrary>], iteration_bounds = array<i64: 1>, scalar_prefetch = 0 : i64, scratch_operands = 0 : i64, tpu.core_type = #tpu.core_type<tc>, window_params = [{pipeline_mode = #tpu.pipeline_mode<synchronous>, transform_indices = @transform_0, window_bounds = array<i64: 16, 32>}, {pipeline_mode = #tpu.pipeline_mode<synchronous>, transform_indices = @transform_1, window_bounds = array<i64: 1, 32>}, {pipeline_mode = #tpu.pipeline_mode<synchronous>, transform_indices = @transform_2, window_bounds = array<i64: 1, 32>}, {pipeline_mode = #tpu.pipeline_mode<synchronous>, transform_indices = @transform_3, window_bounds = array<i64: 16, 32>}]} {
    %c0 = arith.constant 0 : index
    %c0_0 = arith.constant 0 : index
    %0 = vector.load %arg1[%c0, %c0_0] : memref<16x32xf32, #tpu.memory_space<vmem>>, vector<16x32xf32>
    %c0_1 = arith.constant 0 : index
    %c0_2 = arith.constant 0 : index
    %1 = vector.load %arg2[%c0_1, %c0_2] : memref<1x32xf32, #tpu.memory_space<vmem>>, vector<1x32xf32>
    %c0_3 = arith.constant 0 : index
    %c0_4 = arith.constant 0 : index
    %2 = vector.load %arg3[%c0_3, %c0_4] : memref<1x32xf32, #tpu.memory_space<vmem>>, vector<1x32xf32>
    %cst = arith.constant dense<0.000000e+00> : vector<16xf32>
    %3 = vector.multi_reduction <add>, %0, %cst [1] : vector<16x32xf32> to vector<16xf32>
    %4 = vector.shape_cast %3 : vector<16xf32> to vector<16x1xf32>
    %cst_5 = arith.constant 3.200000e+01 : f32
    %5 = vector.broadcast %cst_5 : f32 to vector<16x1xf32>
    %6 = arith.divf %4, %5 : vector<16x1xf32>
    %7 = vector.broadcast %6 : vector<16x1xf32> to vector<16x32xf32>
    %8 = arith.subf %0, %7 : vector<16x32xf32>
    %9 = arith.mulf %8, %8 : vector<16x32xf32>
    %cst_6 = arith.constant dense<0.000000e+00> : vector<16xf32>
    %10 = vector.multi_reduction <add>, %9, %cst_6 [1] : vector<16x32xf32> to vector<16xf32>
    %11 = vector.shape_cast %10 : vector<16xf32> to vector<16x1xf32>
    %cst_7 = arith.constant 3.200000e+01 : f32
    %12 = vector.broadcast %cst_7 : f32 to vector<16x1xf32>
    %13 = arith.divf %11, %12 : vector<16x1xf32>
    %14 = vector.broadcast %6 : vector<16x1xf32> to vector<16x32xf32>
    %15 = arith.subf %0, %14 : vector<16x32xf32>
    %cst_8 = arith.constant 9.99999974E-6 : f32
    %16 = vector.broadcast %cst_8 : f32 to vector<16x1xf32>
    %17 = arith.addf %13, %16 : vector<16x1xf32>
    %18 = math.rsqrt %17 : vector<16x1xf32>
    %19 = vector.broadcast %18 : vector<16x1xf32> to vector<16x32xf32>
    %20 = arith.mulf %15, %19 : vector<16x32xf32>
    %21 = vector.broadcast %1 : vector<1x32xf32> to vector<16x32xf32>
    %22 = arith.mulf %20, %21 : vector<16x32xf32>
    %23 = vector.broadcast %2 : vector<1x32xf32> to vector<16x32xf32>
    %24 = arith.addf %22, %23 : vector<16x32xf32>
    %c0_9 = arith.constant 0 : index
    %c0_10 = arith.constant 0 : index
    %25 = vector.load %arg4[%c0_9, %c0_10] : memref<16x32xf32, #tpu.memory_space<vmem>>, vector<16x32xf32>
    tpu.vector_store %arg4[%c0_9, %c0_10], %24 {strides = array<i32>} : memref<16x32xf32, #tpu.memory_space<vmem>>, vector<16x32xf32>,
    return
  }
  func.func @transform_0(%arg0: i32) -> (i32, i32) {
    %c0_i32 = arith.constant 0 : i32
    %c0_i32_0 = arith.constant 0 : i32
    %c0_i32_1 = arith.constant 0 : i32
    return %c0_i32, %c0_i32_0 : i32, i32
  }
  func.func @transform_1(%arg0: i32) -> (i32, i32) {
    %c0_i32 = arith.constant 0 : i32
    %c0_i32_0 = arith.constant 0 : i32
    %c0_i32_1 = arith.constant 0 : i32
    return %c0_i32, %c0_i32_0 : i32, i32
  }
  func.func @transform_2(%arg0: i32) -> (i32, i32) {
    %c0_i32 = arith.constant 0 : i32
    %c0_i32_0 = arith.constant 0 : i32
    %c0_i32_1 = arith.constant 0 : i32
    return %c0_i32, %c0_i32_0 : i32, i32
  }
  func.func @transform_3(%arg0: i32) -> (i32, i32) {
    %c0_i32 = arith.constant 0 : i32
    %c0_i32_0 = arith.constant 0 : i32
    %c0_i32_1 = arith.constant 0 : i32
    return %c0_i32, %c0_i32_0 : i32, i32
  }
}

module attributes {stable_mosaic.version = 11 : i64} {
  func.func @_head_kernel(%arg0: i32, %arg1: memref<2x32xf32, #tpu.memory_space<vmem>>, %arg2: memref<32x32xbf16, #tpu.memory_space<vmem>>, %arg3: memref<1x32xf32, #tpu.memory_space<vmem>>, %arg4: memref<32x128xbf16, #tpu.memory_space<vmem>>, %arg5: memref<1x128xf32, #tpu.memory_space<vmem>>, %arg6: memref<2x128xf32, #tpu.memory_space<vmem>>) attributes {dimension_semantics = [#tpu.dimension_semantics<arbitrary>], iteration_bounds = array<i64: 1>, scalar_prefetch = 0 : i64, scratch_operands = 0 : i64, tpu.core_type = #tpu.core_type<tc>, window_params = [{pipeline_mode = #tpu.pipeline_mode<synchronous>, transform_indices = @transform_0, window_bounds = array<i64: 2, 32>}, {pipeline_mode = #tpu.pipeline_mode<synchronous>, transform_indices = @transform_1, window_bounds = array<i64: 32, 32>}, {pipeline_mode = #tpu.pipeline_mode<synchronous>, transform_indices = @transform_2, window_bounds = array<i64: 1, 32>}, {pipeline_mode = #tpu.pipeline_mode<synchronous>, transform_indices = @transform_3, window_bounds = array<i64: 32, 128>}, {pipeline_mode = #tpu.pipeline_mode<synchronous>, transform_indices = @transform_4, window_bounds = array<i64: 1, 128>}, {pipeline_mode = #tpu.pipeline_mode<synchronous>, transform_indices = @transform_5, window_bounds = array<i64: 2, 128>}]} {
    %c0 = arith.constant 0 : index
    %c0_0 = arith.constant 0 : index
    %0 = vector.load %arg1[%c0, %c0_0] : memref<2x32xf32, #tpu.memory_space<vmem>>, vector<2x32xf32>
    %1 = arith.truncf %0 : vector<2x32xf32> to vector<2x32xbf16>
    %c0_1 = arith.constant 0 : index
    %c0_2 = arith.constant 0 : index
    %2 = vector.load %arg2[%c0_1, %c0_2] : memref<32x32xbf16, #tpu.memory_space<vmem>>, vector<32x32xbf16>
    %cst = arith.constant dense<0.000000e+00> : vector<2x32xf32>
    %3 = tpu.matmul %1, %2, %cst {dimension_numbers = #tpu.dot_dimension_numbers<[1], [0], [0], [1], [0, 0, 1, 1], [], []>} : vector<2x32xbf16>, vector<32x32xbf16>, vector<2x32xf32> -> vector<2x32xf32>
    %c0_3 = arith.constant 0 : index
    %c0_4 = arith.constant 0 : index
    %4 = vector.load %arg3[%c0_3, %c0_4] : memref<1x32xf32, #tpu.memory_space<vmem>>, vector<1x32xf32>
    %5 = vector.broadcast %4 : vector<1x32xf32> to vector<2x32xf32>
    %6 = arith.addf %3, %5 : vector<2x32xf32>
    %7 = math.tanh %6 : vector<2x32xf32>
    %8 = arith.truncf %7 : vector<2x32xf32> to vector<2x32xbf16>
    %c0_5 = arith.constant 0 : index
    %c0_6 = arith.constant 0 : index
    %9 = vector.load %arg4[%c0_5, %c0_6] : memref<32x128xbf16, #tpu.memory_space<vmem>>, vector<32x128xbf16>
    %cst_7 = arith.constant dense<0.000000e+00> : vector<2x128xf32>
    %10 = tpu.matmul %8, %9, %cst_7 {dimension_numbers = #tpu.dot_dimension_numbers<[1], [0], [0], [1], [0, 0, 1, 1], [], []>} : vector<2x32xbf16>, vector<32x128xbf16>, vector<2x128xf32> -> vector<2x128xf32>
    %c0_8 = arith.constant 0 : index
    %c0_9 = arith.constant 0 : index
    %11 = vector.load %arg5[%c0_8, %c0_9] : memref<1x128xf32, #tpu.memory_space<vmem>>, vector<1x128xf32>
    %12 = vector.broadcast %11 : vector<1x128xf32> to vector<2x128xf32>
    %13 = arith.addf %10, %12 : vector<2x128xf32>
    %cst_10 = arith.constant 0.000000e+00 : f32
    %14 = vector.broadcast %cst_10 : f32 to vector<2x128xf32>
    %15 = arith.maximumf %13, %14 : vector<2x128xf32>
    %c0_11 = arith.constant 0 : index
    %c0_12 = arith.constant 0 : index
    %16 = vector.load %arg6[%c0_11, %c0_12] : memref<2x128xf32, #tpu.memory_space<vmem>>, vector<2x128xf32>
    tpu.vector_store %arg6[%c0_11, %c0_12], %15 {strides = array<i32>} : memref<2x128xf32, #tpu.memory_space<vmem>>, vector<2x128xf32>,
    return
  }
  func.func @transform_0(%arg0: i32) -> (i32, i32) {
    %c0_i32 = arith.constant 0 : i32
    %c0_i32_0 = arith.constant 0 : i32
    %c0_i32_1 = arith.constant 0 : i32
    return %c0_i32, %c0_i32_0 : i32, i32
  }
  func.func @transform_1(%arg0: i32) -> (i32, i32) {
    %c0_i32 = arith.constant 0 : i32
    %c0_i32_0 = arith.constant 0 : i32
    %c0_i32_1 = arith.constant 0 : i32
    return %c0_i32, %c0_i32_0 : i32, i32
  }
  func.func @transform_2(%arg0: i32) -> (i32, i32) {
    %c0_i32 = arith.constant 0 : i32
    %c0_i32_0 = arith.constant 0 : i32
    %c0_i32_1 = arith.constant 0 : i32
    return %c0_i32, %c0_i32_0 : i32, i32
  }
  func.func @transform_3(%arg0: i32) -> (i32, i32) {
    %c0_i32 = arith.constant 0 : i32
    %c0_i32_0 = arith.constant 0 : i32
    %c0_i32_1 = arith.constant 0 : i32
    return %c0_i32, %c0_i32_0 : i32, i32
  }
  func.func @transform_4(%arg0: i32) -> (i32, i32) {
    %c0_i32 = arith.constant 0 : i32
    %c0_i32_0 = arith.constant 0 : i32
    %c0_i32_1 = arith.constant 0 : i32
    return %c0_i32, %c0_i32_0 : i32, i32
  }
  func.func @transform_5(%arg0: i32) -> (i32, i32) {
    %c0_i32 = arith.constant 0 : i32
    %c0_i32_0 = arith.constant 0 : i32
    %c0_i32_1 = arith.constant 0 : i32
    return %c0_i32, %c0_i32_0 : i32, i32
  }
}

module attributes {stable_mosaic.version = 11 : i64} {
  func.func @_encoder_layer_kernel(%arg0: i32, %arg1: memref<1x8x32xf32, #tpu.memory_space<vmem>>, %arg2: memref<1x1x8xf32, #tpu.memory_space<vmem>>, %arg3: memref<32x96xbf16, #tpu.memory_space<vmem>>, %arg4: memref<1x96xf32, #tpu.memory_space<vmem>>, %arg5: memref<32x32xbf16, #tpu.memory_space<vmem>>, %arg6: memref<1x32xf32, #tpu.memory_space<vmem>>, %arg7: memref<1x32xf32, #tpu.memory_space<vmem>>, %arg8: memref<1x32xf32, #tpu.memory_space<vmem>>, %arg9: memref<32x64xbf16, #tpu.memory_space<vmem>>, %arg10: memref<1x64xf32, #tpu.memory_space<vmem>>, %arg11: memref<64x32xbf16, #tpu.memory_space<vmem>>, %arg12: memref<1x32xf32, #tpu.memory_space<vmem>>, %arg13: memref<1x32xf32, #tpu.memory_space<vmem>>, %arg14: memref<1x32xf32, #tpu.memory_space<vmem>>, %arg15: memref<1x8x32xf32, #tpu.memory_space<vmem>>) attributes {dimension_semantics = [#tpu.dimension_semantics<parallel>], iteration_bounds = array<i64: 2>, scalar_prefetch = 0 : i64, scratch_operands = 0 : i64, tpu.core_type = #tpu.core_type<tc>, window_params = [{transform_indices = @transform_0, window_bounds = array<i64: 1, 8, 32>}, {transform_indices = @transform_1, window_bounds = array<i64: 1, 1, 8>}, {pipeline_mode = #tpu.pipeline_mode<synchronous>, transform_indices = @transform_2, window_bounds = array<i64: 32, 96>}, {pipeline_mode = #tpu.pipeline_mode<synchronous>, transform_indices = @transform_3, window_bounds = array<i64: 1, 96>}, {pipeline_mode = #tpu.pipeline_mode<synchronous>, transform_indices = @transform_4, window_bounds = array<i64: 32, 32>}, {pipeline_mode = #tpu.pipeline_mode<synchronous>, transform_indices = @transform_5, window_bounds = array<i64: 1, 32>}, {pipeline_mode = #tpu.pipeline_mode<synchronous>, transform_indices = @transform_6, window_bounds = array<i64: 1, 32>}, {pipeline_mode = #tpu.pipeline_mode<synchronous>, transform_indices = @transform_7, window_bounds = array<i64: 1, 32>}, {pipeline_mode = #tpu.pipeline_mode<synchronous>, transform_indices = @transform_8, window_bounds = array<i64: 32, 64>}, {pipeline_mode = #tpu.pipeline_mode<synchronous>, transform_indices = @transform_9, window_bounds = array<i64: 1, 64>}, {pipeline_mode = #tpu.pipeline_mode<synchronous>, transform_indices = @transform_10, window_bounds = array<i64: 64, 32>}, {pipeline_mode = #tpu.pipeline_mode<synchronous>, transform_indices = @transform_11, window_bounds = array<i64: 1, 32>}, {pipeline_mode = #tpu.pipeline_mode<synchronous>, transform_indices = @transform_12, window_bounds = array<i64: 1, 32>}, {pipeline_mode = #tpu.pipeline_mode<synchronous>, transform_indices = @transform_13, window_bounds = array<i64: 1, 32>}, {transform_indices = @transform_14, window_bounds = array<i64: 1, 8, 32>}]} {
    %c0 = arith.constant 0 : index
    %c0_0 = arith.constant 0 : index
    %c0_1 = arith.constant 0 : index
    %0 = vector.load %arg1[%c0, %c0_0, %c0_1] : memref<1x8x32xf32, #tpu.memory_space<vmem>>, vector<1x8x32xf32>
    %1 = vector.shape_cast %0 : vector<1x8x32xf32> to vector<8x32xf32>
    %c0_2 = arith.constant 0 : index
    %c0_3 = arith.constant 0 : index
    %c0_4 = arith.constant 0 : index
    %2 = vector.load %arg2[%c0_2, %c0_3, %c0_4] : memref<1x1x8xf32, #tpu.memory_space<vmem>>, vector<1x1x8xf32>
    %3 = vector.shape_cast %2 : vector<1x1x8xf32> to vector<1x8xf32>
    %4 = arith.truncf %1 : vector<8x32xf32> to vector<8x32xbf16>
    %c0_5 = arith.constant 0 : index
    %c0_6 = arith.constant 0 : index
    %5 = vector.load %arg3[%c0_5, %c0_6] : memref<32x96xbf16, #tpu.memory_space<vmem>>, vector<32x96xbf16>
    %cst = arith.constant dense<0.000000e+00> : vector<8x96xf32>
    %6 = tpu.matmul %4, %5, %cst {dimension_numbers = #tpu.dot_dimension_numbers<[1], [0], [0], [1], [0, 0, 1, 1], [], []>} : vector<8x32xbf16>, vector<32x96xbf16>, vector<8x96xf32> -> vector<8x96xf32>
    %c0_7 = arith.constant 0 : index
    %c0_8 = arith.constant 0 : index
    %7 = vector.load %arg4[%c0_7, %c0_8] : memref<1x96xf32, #tpu.memory_space<vmem>>, vector<1x96xf32>
    %8 = vector.broadcast %7 : vector<1x96xf32> to vector<8x96xf32>
    %9 = arith.addf %6, %8 : vector<8x96xf32>
    %10 = arith.truncf %9 : vector<8x96xf32> to vector<8x96xbf16>
    %c0_9 = arith.constant 0 : index
    %c0_10 = arith.constant 0 : index
    %11 = vector.load %arg5[%c0_9, %c0_10] : memref<32x32xbf16, #tpu.memory_space<vmem>>, vector<32x32xbf16>
    %cst_11 = arith.constant 0.000000e+00 : f32
    %12 = vector.broadcast %cst_11 : f32 to vector<8x32xf32>
    %13 = vector.extract_strided_slice %10 {offsets = [0, 0], sizes = [8, 8], strides = [1, 1]} : vector<8x96xbf16> to vector<8x8xbf16>
    %14 = vector.extract_strided_slice %10 {offsets = [0, 32], sizes = [8, 8], strides = [1, 1]} : vector<8x96xbf16> to vector<8x8xbf16>
    %15 = vector.extract_strided_slice %10 {offsets = [0, 64], sizes = [8, 8], strides = [1, 1]} : vector<8x96xbf16> to vector<8x8xbf16>
    %cst_12 = arith.constant dense<0.000000e+00> : vector<8x8xf32>
    %16 = tpu.matmul %13, %14, %cst_12 {dimension_numbers = #tpu.dot_dimension_numbers<[1], [1], [0], [0], [0, 0, 1, 0], [], []>} : vector<8x8xbf16>, vector<8x8xbf16>, vector<8x8xf32> -> vector<8x8xf32>
    %cst_13 = arith.constant 0.353553385 : f32
    %17 = vector.broadcast %cst_13 : f32 to vector<8x8xf32>
    %18 = arith.mulf %16, %17 : vector<8x8xf32>
    %19 = vector.broadcast %3 : vector<1x8xf32> to vector<8x8xf32>
    %20 = arith.addf %18, %19 : vector<8x8xf32>
    %cst_14 = arith.constant dense<0xFF800000> : vector<8xf32>
    %21 = vector.multi_reduction <maximumf>, %20, %cst_14 [1] : vector<8x8xf32> to vector<8xf32>
    %22 = vector.shape_cast %21 : vector<8xf32> to vector<8x1xf32>
    %23 = vector.broadcast %22 : vector<8x1xf32> to vector<8x8xf32>
    %24 = arith.subf %20, %23 : vector<8x8xf32>
    %25 = math.exp %24 : vector<8x8xf32>
    %cst_15 = arith.constant dense<0.000000e+00> : vector<8xf32>
    %26 = vector.multi_reduction <add>, %25, %cst_15 [1] : vector<8x8xf32> to vector<8xf32>
    %27 = vector.shape_cast %26 : vector<8xf32> to vector<8x1xf32>
    %28 = tpu.reciprocal %27 {approx = true} : vector<8x1xf32> -> vector<8x1xf32>
    %29 = vector.broadcast %28 : vector<8x1xf32> to vector<8x8xf32>
    %30 = arith.mulf %25, %29 : vector<8x8xf32>
    %31 = arith.truncf %30 : vector<8x8xf32> to vector<8x8xbf16>
    %cst_16 = arith.constant dense<0.000000e+00> : vector<8x8xf32>
    %32 = tpu.matmul %31, %15, %cst_16 {dimension_numbers = #tpu.dot_dimension_numbers<[1], [0], [0], [1], [0, 0, 1, 1], [], []>} : vector<8x8xbf16>, vector<8x8xbf16>, vector<8x8xf32> -> vector<8x8xf32>
    %33 = arith.truncf %32 : vector<8x8xf32> to vector<8x8xbf16>
    %34 = vector.extract_strided_slice %11 {offsets = [0, 0], sizes = [8, 32], strides = [1, 1]} : vector<32x32xbf16> to vector<8x32xbf16>
    %cst_17 = arith.constant dense<0.000000e+00> : vector<8x32xf32>
    %35 = tpu.matmul %33, %34, %cst_17 {dimension_numbers = #tpu.dot_dimension_numbers<[1], [0], [0], [1], [0, 0, 1, 1], [], []>} : vector<8x8xbf16>, vector<8x32xbf16>, vector<8x32xf32> -> vector<8x32xf32>
    %36 = arith.addf %12, %35 : vector<8x32xf32>
    %37 = vector.extract_strided_slice %10 {offsets = [0, 8], sizes = [8, 8], strides = [1, 1]} : vector<8x96xbf16> to vector<8x8xbf16>
    %38 = vector.extract_strided_slice %10 {offsets = [0, 40], sizes = [8, 8], strides = [1, 1]} : vector<8x96xbf16> to vector<8x8xbf16>
    %39 = vector.extract_strided_slice %10 {offsets = [0, 72], sizes = [8, 8], strides = [1, 1]} : vector<8x96xbf16> to vector<8x8xbf16>
    %cst_18 = arith.constant dense<0.000000e+00> : vector<8x8xf32>
    %40 = tpu.matmul %37, %38, %cst_18 {dimension_numbers = #tpu.dot_dimension_numbers<[1], [1], [0], [0], [0, 0, 1, 0], [], []>} : vector<8x8xbf16>, vector<8x8xbf16>, vector<8x8xf32> -> vector<8x8xf32>
    %cst_19 = arith.constant 0.353553385 : f32
    %41 = vector.broadcast %cst_19 : f32 to vector<8x8xf32>
    %42 = arith.mulf %40, %41 : vector<8x8xf32>
    %43 = vector.broadcast %3 : vector<1x8xf32> to vector<8x8xf32>
    %44 = arith.addf %42, %43 : vector<8x8xf32>
    %cst_20 = arith.constant dense<0xFF800000> : vector<8xf32>
    %45 = vector.multi_reduction <maximumf>, %44, %cst_20 [1] : vector<8x8xf32> to vector<8xf32>
    %46 = vector.shape_cast %45 : vector<8xf32> to vector<8x1xf32>
    %47 = vector.broadcast %46 : vector<8x1xf32> to vector<8x8xf32>
    %48 = arith.subf %44, %47 : vector<8x8xf32>
    %49 = math.exp %48 : vector<8x8xf32>
    %cst_21 = arith.constant dense<0.000000e+00> : vector<8xf32>
    %50 = vector.multi_reduction <add>, %49, %cst_21 [1] : vector<8x8xf32> to vector<8xf32>
    %51 = vector.shape_cast %50 : vector<8xf32> to vector<8x1xf32>
    %52 = tpu.reciprocal %51 {approx = true} : vector<8x1xf32> -> vector<8x1xf32>
    %53 = vector.broadcast %52 : vector<8x1xf32> to vector<8x8xf32>
    %54 = arith.mulf %49, %53 : vector<8x8xf32>
    %55 = arith.truncf %54 : vector<8x8xf32> to vector<8x8xbf16>
    %cst_22 = arith.constant dense<0.000000e+00> : vector<8x8xf32>
    %56 = tpu.matmul %55, %39, %cst_22 {dimension_numbers = #tpu.dot_dimension_numbers<[1], [0], [0], [1], [0, 0, 1, 1], [], []>} : vector<8x8xbf16>, vector<8x8xbf16>, vector<8x8xf32> -> vector<8x8xf32>
    %57 = arith.truncf %56 : vector<8x8xf32> to vector<8x8xbf16>
    %58 = vector.extract_strided_slice %11 {offsets = [8, 0], sizes = [8, 32], strides = [1, 1]} : vector<32x32xbf16> to vector<8x32xbf16>
    %cst_23 = arith.constant dense<0.000000e+00> : vector<8x32xf32>
    %59 = tpu.matmul %57, %58, %cst_23 {dimension_numbers = #tpu.dot_dimension_numbers<[1], [0], [0], [1], [0, 0, 1, 1], [], []>} : vector<8x8xbf16>, vector<8x32xbf16>, vector<8x32xf32> -> vector<8x32xf32>
    %60 = arith.addf %36, %59 : vector<8x32xf32>
    %61 = vector.extract_strided_slice %10 {offsets = [0, 16], sizes = [8, 8], strides = [1, 1]} : vector<8x96xbf16> to vector<8x8xbf16>
    %62 = vector.extract_strided_slice %10 {offsets = [0, 48], sizes = [8, 8], strides = [1, 1]} : vector<8x96xbf16> to vector<8x8xbf16>
    %63 = vector.extract_strided_slice %10 {offsets = [0, 80], sizes = [8, 8], strides = [1, 1]} : vector<8x96xbf16> to vector<8x8xbf16>
    %cst_24 = arith.constant dense<0.000000e+00> : vector<8x8xf32>
    %64 = tpu.matmul %61, %62, %cst_24 {dimension_numbers = #tpu.dot_dimension_numbers<[1], [1], [0], [0], [0, 0, 1, 0], [], []>} : vector<8x8xbf16>, vector<8x8xbf16>, vector<8x8xf32> -> vector<8x8xf32>
    %cst_25 = arith.constant 0.353553385 : f32
    %65 = vector.broadcast %cst_25 : f32 to vector<8x8xf32>
    %66 = arith.mulf %64, %65 : vector<8x8xf32>
    %67 = vector.broadcast %3 : vector<1x8xf32> to vector<8x8xf32>
    %68 = arith.addf %66, %67 : vector<8x8xf32>
    %cst_26 = arith.constant dense<0xFF800000> : vector<8xf32>
    %69 = vector.multi_reduction <maximumf>, %68, %cst_26 [1] : vector<8x8xf32> to vector<8xf32>
    %70 = vector.shape_cast %69 : vector<8xf32> to vector<8x1xf32>
    %71 = vector.broadcast %70 : vector<8x1xf32> to vector<8x8xf32>
    %72 = arith.subf %68, %71 : vector<8x8xf32>
    %73 = math.exp %72 : vector<8x8xf32>
    %cst_27 = arith.constant dense<0.000000e+00> : vector<8xf32>
    %74 = vector.multi_reduction <add>, %73, %cst_27 [1] : vector<8x8xf32> to vector<8xf32>
    %75 = vector.shape_cast %74 : vector<8xf32> to vector<8x1xf32>
    %76 = tpu.reciprocal %75 {approx = true} : vector<8x1xf32> -> vector<8x1xf32>
    %77 = vector.broadcast %76 : vector<8x1xf32> to vector<8x8xf32>
    %78 = arith.mulf %73, %77 : vector<8x8xf32>
    %79 = arith.truncf %78 : vector<8x8xf32> to vector<8x8xbf16>
    %cst_28 = arith.constant dense<0.000000e+00> : vector<8x8xf32>
    %80 = tpu.matmul %79, %63, %cst_28 {dimension_numbers = #tpu.dot_dimension_numbers<[1], [0], [0], [1], [0, 0, 1, 1], [], []>} : vector<8x8xbf16>, vector<8x8xbf16>, vector<8x8xf32> -> vector<8x8xf32>
    %81 = arith.truncf %80 : vector<8x8xf32> to vector<8x8xbf16>
    %82 = vector.extract_strided_slice %11 {offsets = [16, 0], sizes = [8, 32], strides = [1, 1]} : vector<32x32xbf16> to vector<8x32xbf16>
    %cst_29 = arith.constant dense<0.000000e+00> : vector<8x32xf32>
    %83 = tpu.matmul %81, %82, %cst_29 {dimension_numbers = #tpu.dot_dimension_numbers<[1], [0], [0], [1], [0, 0, 1, 1], [], []>} : vector<8x8xbf16>, vector<8x32xbf16>, vector<8x32xf32> -> vector<8x32xf32>
    %84 = arith.addf %60, %83 : vector<8x32xf32>
    %85 = vector.extract_strided_slice %10 {offsets = [0, 24], sizes = [8, 8], strides = [1, 1]} : vector<8x96xbf16> to vector<8x8xbf16>
    %86 = vector.extract_strided_slice %10 {offsets = [0, 56], sizes = [8, 8], strides = [1, 1]} : vector<8x96xbf16> to vector<8x8xbf16>
    %87 = vector.extract_strided_slice %10 {offsets = [0, 88], sizes = [8, 8], strides = [1, 1]} : vector<8x96xbf16> to vector<8x8xbf16>
    %cst_30 = arith.constant dense<0.000000e+00> : vector<8x8xf32>
    %88 = tpu.matmul %85, %86, %cst_30 {dimension_numbers = #tpu.dot_dimension_numbers<[1], [1], [0], [0], [0, 0, 1, 0], [], []>} : vector<8x8xbf16>, vector<8x8xbf16>, vector<8x8xf32> -> vector<8x8xf32>
    %cst_31 = arith.constant 0.353553385 : f32
    %89 = vector.broadcast %cst_31 : f32 to vector<8x8xf32>
    %90 = arith.mulf %88, %89 : vector<8x8xf32>
    %91 = vector.broadcast %3 : vector<1x8xf32> to vector<8x8xf32>
    %92 = arith.addf %90, %91 : vector<8x8xf32>
    %cst_32 = arith.constant dense<0xFF800000> : vector<8xf32>
    %93 = vector.multi_reduction <maximumf>, %92, %cst_32 [1] : vector<8x8xf32> to vector<8xf32>
    %94 = vector.shape_cast %93 : vector<8xf32> to vector<8x1xf32>
    %95 = vector.broadcast %94 : vector<8x1xf32> to vector<8x8xf32>
    %96 = arith.subf %92, %95 : vector<8x8xf32>
    %97 = math.exp %96 : vector<8x8xf32>
    %cst_33 = arith.constant dense<0.000000e+00> : vector<8xf32>
    %98 = vector.multi_reduction <add>, %97, %cst_33 [1] : vector<8x8xf32> to vector<8xf32>
    %99 = vector.shape_cast %98 : vector<8xf32> to vector<8x1xf32>
    %100 = tpu.reciprocal %99 {approx = true} : vector<8x1xf32> -> vector<8x1xf32>
    %101 = vector.broadcast %100 : vector<8x1xf32> to vector<8x8xf32>
    %102 = arith.mulf %97, %101 : vector<8x8xf32>
    %103 = arith.truncf %102 : vector<8x8xf32> to vector<8x8xbf16>
    %cst_34 = arith.constant dense<0.000000e+00> : vector<8x8xf32>
    %104 = tpu.matmul %103, %87, %cst_34 {dimension_numbers = #tpu.dot_dimension_numbers<[1], [0], [0], [1], [0, 0, 1, 1], [], []>} : vector<8x8xbf16>, vector<8x8xbf16>, vector<8x8xf32> -> vector<8x8xf32>
    %105 = arith.truncf %104 : vector<8x8xf32> to vector<8x8xbf16>
    %106 = vector.extract_strided_slice %11 {offsets = [24, 0], sizes = [8, 32], strides = [1, 1]} : vector<32x32xbf16> to vector<8x32xbf16>
    %cst_35 = arith.constant dense<0.000000e+00> : vector<8x32xf32>
    %107 = tpu.matmul %105, %106, %cst_35 {dimension_numbers = #tpu.dot_dimension_numbers<[1], [0], [0], [1], [0, 0, 1, 1], [], []>} : vector<8x8xbf16>, vector<8x32xbf16>, vector<8x32xf32> -> vector<8x32xf32>
    %108 = arith.addf %84, %107 : vector<8x32xf32>
    %c0_36 = arith.constant 0 : index
    %c0_37 = arith.constant 0 : index
    %109 = vector.load %arg6[%c0_36, %c0_37] : memref<1x32xf32, #tpu.memory_space<vmem>>, vector<1x32xf32>
    %110 = vector.broadcast %109 : vector<1x32xf32> to vector<8x32xf32>
    %111 = arith.addf %108, %110 : vector<8x32xf32>
    %112 = arith.addf %111, %1 : vector<8x32xf32>
    %c0_38 = arith.constant 0 : index
    %c0_39 = arith.constant 0 : index
    %113 = vector.load %arg7[%c0_38, %c0_39] : memref<1x32xf32, #tpu.memory_space<vmem>>, vector<1x32xf32>
    %c0_40 = arith.constant 0 : index
    %c0_41 = arith.constant 0 : index
    %114 = vector.load %arg8[%c0_40, %c0_41] : memref<1x32xf32, #tpu.memory_space<vmem>>, vector<1x32xf32>
    %cst_42 = arith.constant dense<0.000000e+00> : vector<8xf32>
    %115 = vector.multi_reduction <add>, %112, %cst_42 [1] : vector<8x32xf32> to vector<8xf32>
    %116 = vector.shape_cast %115 : vector<8xf32> to vector<8x1xf32>
    %cst_43 = arith.constant 3.200000e+01 : f32
    %117 = vector.broadcast %cst_43 : f32 to vector<8x1xf32>
    %118 = arith.divf %116, %117 : vector<8x1xf32>
    %119 = vector.broadcast %118 : vector<8x1xf32> to vector<8x32xf32>
    %120 = arith.subf %112, %119 : vector<8x32xf32>
    %121 = arith.mulf %120, %120 : vector<8x32xf32>
    %cst_44 = arith.constant dense<0.000000e+00> : vector<8xf32>
    %122 = vector.multi_reduction <add>, %121, %cst_44 [1] : vector<8x32xf32> to vector<8xf32>
    %123 = vector.shape_cast %122 : vector<8xf32> to vector<8x1xf32>
    %cst_45 = arith.constant 3.200000e+01 : f32
    %124 = vector.broadcast %cst_45 : f32 to vector<8x1xf32>
    %125 = arith.divf %123, %124 : vector<8x1xf32>
    %126 = vector.broadcast %118 : vector<8x1xf32> to vector<8x32xf32>
    %127 = arith.subf %112, %126 : vector<8x32xf32>
    %cst_46 = arith.constant 9.99999974E-6 : f32
    %128 = vector.broadcast %cst_46 : f32 to vector<8x1xf32>
    %129 = arith.addf %125, %128 : vector<8x1xf32>
    %130 = math.rsqrt %129 : vector<8x1xf32>
    %131 = vector.broadcast %130 : vector<8x1xf32> to vector<8x32xf32>
    %132 = arith.mulf %127, %131 : vector<8x32xf32>
    %133 = vector.broadcast %113 : vector<1x32xf32> to vector<8x32xf32>
    %134 = arith.mulf %132, %133 : vector<8x32xf32>
    %135 = vector.broadcast %114 : vector<1x32xf32> to vector<8x32xf32>
    %136 = arith.addf %134, %135 : vector<8x32xf32>
    %137 = arith.truncf %136 : vector<8x32xf32> to vector<8x32xbf16>
    %c0_47 = arith.constant 0 : index
    %c0_48 = arith.constant 0 : index
    %138 = vector.load %arg9[%c0_47, %c0_48] : memref<32x64xbf16, #tpu.memory_space<vmem>>, vector<32x64xbf16>
    %cst_49 = arith.constant dense<0.000000e+00> : vector<8x64xf32>
    %139 = tpu.matmul %137, %138, %cst_49 {dimension_numbers = #tpu.dot_dimension_numbers<[1], [0], [0], [1], [0, 0, 1, 1], [], []>} : vector<8x32xbf16>, vector<32x64xbf16>, vector<8x64xf32> -> vector<8x64xf32>
    %c0_50 = arith.constant 0 : index
    %c0_51 = arith.constant 0 : index
    %140 = vector.load %arg10[%c0_50, %c0_51] : memref<1x64xf32, #tpu.memory_space<vmem>>, vector<1x64xf32>
    %141 = vector.broadcast %140 : vector<1x64xf32> to vector<8x64xf32>
    %142 = arith.addf %139, %141 : vector<8x64xf32>
    %cst_52 = arith.constant 5.000000e-01 : f32
    %143 = vector.broadcast %cst_52 : f32 to vector<8x64xf32>
    %144 = arith.mulf %143, %142 : vector<8x64xf32>
    %cst_53 = arith.constant 4.471500e-02 : f32
    %145 = vector.broadcast %cst_53 : f32 to vector<8x64xf32>
    %146 = arith.mulf %145, %142 : vector<8x64xf32>
    %147 = arith.mulf %146, %142 : vector<8x64xf32>
    %148 = arith.mulf %147, %142 : vector<8x64xf32>
    %149 = arith.addf %142, %148 : vector<8x64xf32>
    %cst_54 = arith.constant 0.797884583 : f32
    %150 = vector.broadcast %cst_54 : f32 to vector<8x64xf32>
    %151 = arith.mulf %150, %149 : vector<8x64xf32>
    %152 = math.tanh %151 : vector<8x64xf32>
    %cst_55 = arith.constant 1.000000e+00 : f32
    %153 = vector.broadcast %cst_55 : f32 to vector<8x64xf32>
    %154 = arith.addf %153, %152 : vector<8x64xf32>
    %155 = arith.mulf %144, %154 : vector<8x64xf32>
    %156 = arith.truncf %155 : vector<8x64xf32> to vector<8x64xbf16>
    %c0_56 = arith.constant 0 : index
    %c0_57 = arith.constant 0 : index
    %157 = vector.load %arg11[%c0_56, %c0_57] : memref<64x32xbf16, #tpu.memory_space<vmem>>, vector<64x32xbf16>
    %cst_58 = arith.constant dense<0.000000e+00> : vector<8x32xf32>
    %158 = tpu.matmul %156, %157, %cst_58 {dimension_numbers = #tpu.dot_dimension_numbers<[1], [0], [0], [1], [0, 0, 1, 1], [], []>} : vector<8x64xbf16>, vector<64x32xbf16>, vector<8x32xf32> -> vector<8x32xf32>
    %c0_59 = arith.constant 0 : index
    %c0_60 = arith.constant 0 : index
    %159 = vector.load %arg12[%c0_59, %c0_60] : memref<1x32xf32, #tpu.memory_space<vmem>>, vector<1x32xf32>
    %160 = vector.broadcast %159 : vector<1x32xf32> to vector<8x32xf32>
    %161 = arith.addf %158, %160 : vector<8x32xf32>
    %162 = arith.addf %161, %136 : vector<8x32xf32>
    %c0_61 = arith.constant 0 : index
    %c0_62 = arith.constant 0 : index
    %163 = vector.load %arg13[%c0_61, %c0_62] : memref<1x32xf32, #tpu.memory_space<vmem>>, vector<1x32xf32>
    %c0_63 = arith.constant 0 : index
    %c0_64 = arith.constant 0 : index
    %164 = vector.load %arg14[%c0_63, %c0_64] : memref<1x32xf32, #tpu.memory_space<vmem>>, vector<1x32xf32>
    %cst_65 = arith.constant dense<0.000000e+00> : vector<8xf32>
    %165 = vector.multi_reduction <add>, %162, %cst_65 [1] : vector<8x32xf32> to vector<8xf32>
    %166 = vector.shape_cast %165 : vector<8xf32> to vector<8x1xf32>
    %cst_66 = arith.constant 3.200000e+01 : f32
    %167 = vector.broadcast %cst_66 : f32 to vector<8x1xf32>
    %168 = arith.divf %166, %167 : vector<8x1xf32>
    %169 = vector.broadcast %168 : vector<8x1xf32> to vector<8x32xf32>
    %170 = arith.subf %162, %169 : vector<8x32xf32>
    %171 = arith.mulf %170, %170 : vector<8x32xf32>
    %cst_67 = arith.constant dense<0.000000e+00> : vector<8xf32>
    %172 = vector.multi_reduction <add>, %171, %cst_67 [1] : vector<8x32xf32> to vector<8xf32>
    %173 = vector.shape_cast %172 : vector<8xf32> to vector<8x1xf32>
    %cst_68 = arith.constant 3.200000e+01 : f32
    %174 = vector.broadcast %cst_68 : f32 to vector<8x1xf32>
    %175 = arith.divf %173, %174 : vector<8x1xf32>
    %176 = vector.broadcast %168 : vector<8x1xf32> to vector<8x32xf32>
    %177 = arith.subf %162, %176 : vector<8x32xf32>
    %cst_69 = arith.constant 9.99999974E-6 : f32
    %178 = vector.broadcast %cst_69 : f32 to vector<8x1xf32>
    %179 = arith.addf %175, %178 : vector<8x1xf32>
    %180 = math.rsqrt %179 : vector<8x1xf32>
    %181 = vector.broadcast %180 : vector<8x1xf32> to vector<8x32xf32>
    %182 = arith.mulf %177, %181 : vector<8x32xf32>
    %183 = vector.broadcast %163 : vector<1x32xf32> to vector<8x32xf32>
    %184 = arith.mulf %182, %183 : vector<8x32xf32>
    %185 = vector.broadcast %164 : vector<1x32xf32> to vector<8x32xf32>
    %186 = arith.addf %184, %185 : vector<8x32xf32>
    %c0_70 = arith.constant 0 : index
    %c0_71 = arith.constant 0 : index
    %c0_72 = arith.constant 0 : index
    %187 = vector.load %arg15[%c0_70, %c0_71, %c0_72] : memref<1x8x32xf32, #tpu.memory_space<vmem>>, vector<1x8x32xf32>
    %188 = vector.shape_cast %187 : vector<1x8x32xf32> to vector<8x32xf32>
    %189 = vector.shape_cast %186 : vector<8x32xf32> to vector<1x8x32xf32>
    tpu.vector_store %arg15[%c0_70, %c0_71, %c0_72], %189 {strides = array<i32>} : memref<1x8x32xf32, #tpu.memory_space<vmem>>, vector<1x8x32xf32>,
    return
  }
  func.func @transform_0(%arg0: i32) -> (i32, i32, i32) {
    %c0_i32 = arith.constant 0 : i32
    %c0_i32_0 = arith.constant 0 : i32
    %c0_i32_1 = arith.constant 0 : i32
    return %arg0, %c0_i32, %c0_i32_0 : i32, i32, i32
  }
  func.func @transform_1(%arg0: i32) -> (i32, i32, i32) {
    %c0_i32 = arith.constant 0 : i32
    %c0_i32_0 = arith.constant 0 : i32
    %c0_i32_1 = arith.constant 0 : i32
    return %arg0, %c0_i32, %c0_i32_0 : i32, i32, i32
  }
  func.func @transform_2(%arg0: i32) -> (i32, i32) {
    %c0_i32 = arith.constant 0 : i32
    %c0_i32_0 = arith.constant 0 : i32
    %c0_i32_1 = arith.constant 0 : i32
    return %c0_i32, %c0_i32_0 : i32, i32
  }
  func.func @transform_3(%arg0: i32) -> (i32, i32) {
    %c0_i32 = arith.constant 0 : i32
    %c0_i32_0 = arith.constant 0 : i32
    %c0_i32_1 = arith.constant 0 : i32
    return %c0_i32, %c0_i32_0 : i32, i32
  }
  func.func @transform_4(%arg0: i32) -> (i32, i32) {
    %c0_i32 = arith.constant 0 : i32
    %c0_i32_0 = arith.constant 0 : i32
    %c0_i32_1 = arith.constant 0 : i32
    return %c0_i32, %c0_i32_0 : i32, i32
  }
  func.func @transform_5(%arg0: i32) -> (i32, i32) {
    %c0_i32 = arith.constant 0 : i32
    %c0_i32_0 = arith.constant 0 : i32
    %c0_i32_1 = arith.constant 0 : i32
    return %c0_i32, %c0_i32_0 : i32, i32
  }
  func.func @transform_6(%arg0: i32) -> (i32, i32) {
    %c0_i32 = arith.constant 0 : i32
    %c0_i32_0 = arith.constant 0 : i32
    %c0_i32_1 = arith.constant 0 : i32
    return %c0_i32, %c0_i32_0 : i32, i32
  }
  func.func @transform_7(%arg0: i32) -> (i32, i32) {
    %c0_i32 = arith.constant 0 : i32
    %c0_i32_0 = arith.constant 0 : i32
    %c0_i32_1 = arith.constant 0 : i32
    return %c0_i32, %c0_i32_0 : i32, i32
  }
  func.func @transform_8(%arg0: i32) -> (i32, i32) {
    %c0_i32 = arith.constant 0 : i32
    %c0_i32_0 = arith.constant 0 : i32
    %c0_i32_1 = arith.constant 0 : i32
    return %c0_i32, %c0_i32_0 : i32, i32
  }
  func.func @transform_9(%arg0: i32) -> (i32, i32) {
    %c0_i32 = arith.constant 0 : i32
    %c0_i32_0 = arith.constant 0 : i32
    %c0_i32_1 = arith.constant 0 : i32
    return %c0_i32, %c0_i32_0 : i32, i32
  }
  func.func @transform_10(%arg0: i32) -> (i32, i32) {
    %c0_i32 = arith.constant 0 : i32
    %c0_i32_0 = arith.constant 0 : i32
    %c0_i32_1 = arith.constant 0 : i32
    return %c0_i32, %c0_i32_0 : i32, i32
  }
  func.func @transform_11(%arg0: i32) -> (i32, i32) {
    %c0_i32 = arith.constant 0 : i32
    %c0_i32_0 = arith.constant 0 : i32
    %c0_i32_1 = arith.constant 0 : i32
    return %c0_i32, %c0_i32_0 : i32, i32
  }
  func.func @transform_12(%arg0: i32) -> (i32, i32) {
    %c0_i32 = arith.constant 0 : i32
    %c0_i32_0 = arith.constant 0 : i32
    %c0_i32_1 = arith.constant 0 : i32
    return %c0_i32, %c0_i32_0 : i32, i32
  }
  func.func @transform_13(%arg0: i32) -> (i32, i32) {
    %c0_i32 = arith.constant 0 : i32
    %c0_i32_0 = arith.constant 0 : i32
    %c0_i32_1 = arith.constant 0 : i32
    return %c0_i32, %c0_i32_0 : i32, i32
  }
  func.func @transform_14(%arg0: i32) -> (i32, i32, i32) {
    %c0_i32 = arith.constant 0 : i32
    %c0_i32_0 = arith.constant 0 : i32
    %c0_i32_1 = arith.constant 0 : i32
    return %arg0, %c0_i32, %c0_i32_0 : i32, i32, i32
  }
}

</mosaic_0001>

<bundles_post_ra>
// kernel: bert_classifier_forward.4
= control target key start
LH: loop header
LB: loop body
LE: loop exit
PB: predicated region body
PF: predicated region fallthrough
CT: control target
= control target key end

     0   :  { %vm18_vm0 = vcmask 261120   ;;  %s118_s0 = inlined_call_operand.vmem [shape: f32[16,32], index: 0, kind: input, shape index: {}]   ;;  %s119_s1 = inlined_call_operand.vmem [shape: f32[1,32], index: 1, kind: input, shape index: {}]   ;;  %s120_s2 = inlined_call_operand.vmem [shape: f32[1,32], index: 2, kind: input, shape index: {}]   ;;  %s121_s3 = inlined_call_operand.vmem [shape: f32[16,32], index: 3, kind: output, shape index: {}]  }
   0x1   :  { %v14_v0 = vld [vmem:[%s118_s0] sm:$0xff]  ;;  %v15_v1 = vld [vmem:[%s118_s0 + $0x8] sm:$0xff] }
   0x2   :  { %v19_v2 = vsel %vm18_vm0, %v14_v0, 0.0  ;;  %v22_v3 = vsel %vm18_vm0, %v15_v1, 0.0  ;;  %v68_v21 = vld [vmem:[%s119_s1] ss:$0 sm:$0xff] }
   0x3   :  { %20 = vadd.xlane.f32.xlu0 %v19_v2  ;;  %v69_v23 = vld [vmem:[%s120_s2] ss:$0 sm:$0xff] }
   0x7   :  { %23 = vadd.xlane.f32.xlu0 %v22_v3 }
  0x8c   :  { %v21_v4 = vpop.xlane.xlu0 %20 }
  0x8d   :  { %v26_v5 = vmul.f32 0.03125, %v21_v4 }
  0x8f   :  { %v28_v6 = vsub.f32 %v14_v0, %v26_v5 }
  0x90   :  { %v24_v7 = vpop.xlane.xlu0 %23 }
  0x91   :  { %v27_v8 = vmul.f32 0.03125, %v24_v7  ;;  %v30_v9 = vmul.f32 %v28_v6, %v28_v6 }
  0x93   :  { %v29_v10 = vsub.f32 %v15_v1, %v27_v8  ;;  %v32_v11 = vsel %vm18_vm0, %v30_v9, 0.0 }
  0x94   :  { %33 = vadd.xlane.f32.xlu1 %v32_v11 }
  0x95   :  { %v31_v12 = vmul.f32 %v29_v10, %v29_v10 }
  0x97   :  { %v35_v13 = vsel %vm18_vm0, %v31_v12, 0.0 }
  0x98   :  { %36 = vadd.xlane.f32.xlu1 %v35_v13 }
 0x11d   :  { %v34_v14 = vpop.xlane.xlu1 %33 }
 0x11e   :  { %v38_v15 = vmul.f32 0.03125, %v34_v14 }
 0x120   :  { %v40_v16 = vadd.f32 1e-05, %v38_v15 }
 0x121   :  { %v37_v17 = vpop.xlane.xlu1 %36 }
 0x122   :  { %70 = vrsqrt.f32 %v40_v16  ;;  %v39_v18 = vmul.f32 0.03125, %v37_v17 }
 0x124   :  { %v41_v19 = vadd.f32 1e-05, %v39_v18 }
 0x126   :  { %72 = vrsqrt.f32 %v41_v19 }
 0x12f   :  { %v71_v20 = vpop.eup %70 }
 0x130   :  { %v44_v22 = vmul.f32 %v71_v20, %v28_v6 }
 0x132   :  { %v52_v24 = vmul.f32 %v68_v21, %v44_v22 }
 0x133   :  { %v73_v25 = vpop.eup %72 }
 0x134   :  { %v60_v26 = vadd.f32 %v69_v23, %v52_v24  ;;  %v45_v27 = vmul.f32 %v73_v25, %v29_v10 }
 0x136   :  { %62 = vst.msk [vmem:[%s121_s3] sm:$0xff] %vm18_vm0, %v60_v26  ;;  %v53_v28 = vmul.f32 %v68_v21, %v45_v27 }
 0x138   :  { %v61_v29 = vadd.f32 %v69_v23, %v53_v28 }
 0x13a   :  { %63 = vst.msk [vmem:[%s121_s3 + $0x8] sm:$0xff] %vm18_vm0, %v61_v29 }

// kernel: bert_classifier_forward.7
= control target key start
LH: loop header
LB: loop body
LE: loop exit
PB: predicated region body
PF: predicated region fallthrough
CT: control target
= control target key end

     0   :  { %v236_v1 = vmov 0.0   ;;  %vm237_vm0 = vmmov 0   ;;  %s295_s0 = inlined_call_operand.vmem [shape: f32[2,32], index: 0, kind: input, shape index: {}]   ;;  %s296_s1 = inlined_call_operand.vmem [shape: bf16[32,32], index: 1, kind: input, shape index: {}]   ;;  %s297_s2 = inlined_call_operand.vmem [shape: f32[1,32], index: 2, kind: input, shape index: {}]   ;;  %s298_s3 = inlined_call_operand.vmem [shape: bf16[32,128], index: 3, kind: input, shape index: {}]   ;;  %s299_s4 = inlined_call_operand.vmem [shape: f32[1,128], index: 4, kind: input, shape index: {}]   ;;  %s300_s5 = inlined_call_operand.hbm [shape: f32[2,128], index: 5, kind: output, shape index: {}]  }
   0x1   :  { %v208_v0 = vld [vmem:[%s296_s1 + $0x8] sm:$0xff]   ;;  %189 = vmatprep.subr.bf16.mxu0 %v236_v1  ;;  %197 = vmatprep.subr.bf16.mxu1 %v236_v1  ;;  %v209_v2 = vld [vmem:[%s296_s1] sm:$0xff]  }
   0x2   :  { %190 = vmatpush3.bf16.msra.mxu0 %v208_v0  ;;  %193 = vmatprep.mubr.msk.bf16.mxu0 %vm237_vm0, %v236_v1  ;;  %v22_v3 = vld [vmem:[%s295_s0] sm:$0x3] }
   0x3   :  { %191 = vmatprep.subr.bf16.mxu0 %v236_v1  ;;  %201 = vmatprep.mubr.msk.bf16.mxu1 %vm237_vm0, %v236_v1 }
   0x4   :  { %10 = vsyncpa [#allocation3], 0  ;;  %v23_v4 = vpack.c.bf16 %v22_v3, %v22_v3  ;;  %vm47_vm1 = vcmask 261120   ;;  %v210_v5 = vld [vmem:[%s298_s3 + $0x8] sm:$0xff]   ;;  %v211_v6 = vld [vmem:[%s298_s3] sm:$0xff]   ;;  %s238_s3 = smov [#allocation2]  }
   0x5   :  { %198 = vmatpush3.bf16.msra.mxu1 %v210_v5  ;;  %v175_v7 = vld [vmem:[%s297_s2] ss:$0 sm:$0xff]  ;;  %s167_s30 = sshll.u32 %s238_s3, 4  ;;  %s168_s30 = int_to_ptr.vmem [resolvable:$true] %s167_s30 }
   0x6   :  { %192 = vmatpush3.bf16.msra.mxu0 %v209_v2  ;;  %199 = vmatprep.subr.bf16.mxu1 %v236_v1  ;;  %v179_v15 = vld [vmem:[%s299_s4] ss:$0 sm:$0xff]  ;;  %s214_s2 = scalar_lea.vmem %s168_s30, 32  ;;  %p219_p1 = scmp.lt.s32.totalorder %s168_s30, %s168_s30 }
   0x7   :  { %p215_p0 = scmp.ne.s32.totalorder %s168_s30, %s214_s2  ;;  %p220_p2 = scmp.lt.s32.totalorder %s214_s2, %s214_s2 }
   0x9   :  { %194 = vmatmul.mubr.msk.bf16.vlgmr.msra.gmra.mxu0 %vm47_vm1, %v23_v4  ;;  %200 = vmatpush3.bf16.msra.mxu1 %v211_v6  ;;  %p221_p3 = por %p220_p2, %p219_p1 }
   0xb   :  { %p222_p4 = pnand %p221_p3, %p215_p0 }
  0xc9   :  { %v85_v8 = vpop.f32.mrf.mxu0 }
  0xca   :  { %v86_v9 = vadd.f32 %v175_v7, %v85_v8 }
  0xcb   :  { %v195_v10 = vpop.f32.mrf.mxu0 }
  0xcc   :  { %212 = vtanh.f32 %v86_v9 }
  0xcd   :  { %v88_v11 = vpop.f32.mrf.mxu0 }
  0xcf   :  { %v196_v12 = vpop.f32.mrf.mxu0 }
  0xd9   :  { %v213_v13 = vpop.eup %212 }
  0xda   :  { %v92_v14 = vpack.c.bf16 %v213_v13, %v213_v13 }
  0xdc   :  { %202 = vmatmul.mubr.msk.bf16.vlgmr.msra.gmra.mxu1 %vm47_vm1, %v92_v14 }
 0x19c   :  { %v153_v16 = vpop.f32.mrf.mxu1 }
 0x19d   :  { %v154_v17 = vadd.f32 %v179_v15, %v153_v16 }
 0x19e   :  { %v203_v18 = vpop.f32.mrf.mxu1 }
 0x19f   :  { %v159_v19 = vmax.f32 %v154_v17, 0.0 }
 0x1a0   :  { %v156_v20 = vpop.f32.mrf.mxu1 }
 0x1a1   :  { %160 = vst [vmem:[#allocation2] sm:$0x3] %v159_v19 }
 0x1a2   :  { %v204_v21 = vpop.f32.mrf.mxu1 }
 0x1a3   :  { %225 = shalt.err (!%p222_p4)
}
 0x1a4   :  { %170 = dma.vmem_to_hbm [thread:$0]  %s168_s30, 32, %s300_s5, [#allocation3]  }
 0x1a5   :  { %234 = dma.done.wait [#allocation3], 32  }
 0x1a6   :  { %235 = vsyncadd [#allocation3], 4294967264 }
 0x1a7   :  { %174 = vsyncpa [#allocation3], 1 }

// kernel: bert_classifier_forward.5
= control target key start
LH: loop header
LB: loop body
LE: loop exit
PB: predicated region body
PF: predicated region fallthrough
CT: control target
= control target key end

     0   :  { %s1813_s29 = smov 0   ;;  %s2018_s0 = inlined_call_operand.vmem [shape: f32[2,8,32], index: 0, kind: input, shape index: {}]   ;;  %s2019_s1 = inlined_call_operand.vmem [shape: f32[2,1,8], index: 1, kind: input, shape index: {}]   ;;  %s2020_s2 = inlined_call_operand.vmem [shape: bf16[32,96], index: 2, kind: input, shape index: {}]   ;;  %s2021_s3 = inlined_call_operand.vmem [shape: f32[1,96], index: 3, kind: input, shape index: {}]   ;;  %s2022_s4 = inlined_call_operand.vmem [shape: bf16[32,32], index: 4, kind: input, shape index: {}]   ;;  %s2023_s5 = inlined_call_operand.vmem [shape: f32[1,32], index: 5, kind: input, shape index: {}]   ;;  %s2024_s6 = inlined_call_operand.vmem [shape: f32[1,32], index: 6, kind: input, shape index: {}]   ;;  %s2025_s7 = inlined_call_operand.vmem [shape: f32[1,32], index: 7, kind: input, shape index: {}]   ;;  %s2026_s8 = inlined_call_operand.vmem [shape: bf16[32,64], index: 8, kind: input, shape index: {}]   ;;  %s2027_s9 = inlined_call_operand.vmem [shape: f32[1,64], index: 9, kind: input, shape index: {}]   ;;  %s2028_s10 = inlined_call_operand.vmem [shape: bf16[64,32], index: 10, kind: input, shape index: {}]   ;;  %s2029_s11 = inlined_call_operand.vmem [shape: f32[1,32], index: 11, kind: input, shape index: {}]   ;;  %s2030_s12 = inlined_call_operand.vmem [shape: f32[1,32], index: 12, kind: input, shape index: {}]   ;;  %s2031_s13 = inlined_call_operand.vmem [shape: f32[1,32], index: 13, kind: input, shape index: {}]   ;;  %s2032_s14 = inlined_call_operand.vmem [shape: f32[2,8,32], index: 14, kind: output, shape index: {}]  }
   0x1 LB: > { %s1490_s30 = sadd.s32 4294967295, %s1723_s29   ;;  %p1494_p0 = scmp.ge.s32.totalorder %s1723_s29, 1  ;;  %s1723_s29 = sphi %s1813_s29, %s24_s29  }
   0x2   : > { %p419_p1 = scmp.lt.s32.totalorder %s1723_s29, 3 }
   0x4   : > { %p420_p2 = pnand %p1494_p0, %p419_p1 }
   0x5   : > { %p466_p3 = scmp.lt.s32.totalorder (!%p420_p2), %s1490_s30, 1  ;;  %s1727_s25 = smov (!%p420_p2), 120  }
   0x6   : > { %423 = sbr.rel (%p420_p2) target bundleno = 3527 (0xdc7), region = 76  ;;  %s1728_s26 = smov (!%p420_p2), 96  }
   0x7   : > { %s1729_s27 = smov (!%p420_p2), 88   ;;  %s1730_s17 = smov (!%p420_p2), 64  }
   0x8   : > { %s1731_s18 = smov (!%p420_p2), 56   ;;  %s1732_s20 = smov (!%p420_p2), 112  }
   0x9   : > { %s1733_s21 = smov (!%p420_p2), 80   ;;  %s1736_s28 = smov (!%p420_p2), 48  }
   0xb   : > { %v1687_v0 = vld [vmem:[%s2020_s2 + $0x8] sm:$0xff]   ;;  %v1725_v1 = vmov 0.0   ;;  %v1688_v2 = vld [vmem:[%s2020_s2] sm:$0xff]   ;;  %vm1726_vm0 = vmmov 0   ;;  %s2034_s30 = smov (!%p466_p3, %s1490_s30), 1  ;;  %vm504_vm1 = vcmask 261120  }
   0xc   : > { %1566 = vmatprep.subr.bf16.mxu1 %v1725_v1  ;;  %1580 = vmatprep.subr.bf16.mxu0 %v1725_v1  ;;  %s1495_s19 = sshll.u32 %s2034_s30, 3  ;;  %v1497_v5 = vld [vmem:[%s2021_s3] ss:$0 sm:$0xff]  ;;  %vm556_vm2 = vcmask 64512   ;;  %s472_s16 = scalar_lea.vmem %s2019_s1, %s2034_s30  ;;  %vm628_vm3 = vcmask 1043456   ;;  %vm1353_vm4 = vcmask 523264  }
   0xd   : > { %1567 = vmatpush3.bf16.msra.mxu1 %v1687_v0  ;;  %1570 = vmatprep.mubr.msk.bf16.mxu1 %vm1726_vm0, %v1725_v1  ;;  %s469_s22 = scalar_lea.vmem %s2018_s0, %s1495_s19  ;;  %v1873_v18 = vld [vmem:[%s472_s16] ss:$0 sm:$0xff]  ;;  %v550_v56 = vld [vmem:[%s2022_s4 + $0x4] sm:$0xf]  ;;  %s476_s23 = scalar_lea.vmem %s2032_s14, %s1495_s19 }
   0xe   : > { %1568 = vmatprep.subr.bf16.mxu1 %v1725_v1  ;;  %1582 = vmatprep.mubr.msk.bf16.mxu0 %vm1726_vm0, %v1725_v1  ;;  %v1843_v3 = vld [vmem:[%s469_s22] sm:$0xff]  ;;  %v790_v57 = vsel %vm628_vm3, %v550_v56, 0 }
   0xf   : > { %v480_v4 = vpack.c.bf16 %v1843_v3, %v1843_v3  ;;  %v549_v54 = vld [vmem:[%s2022_s4] sm:$0xf] }
  0x10   : > { %v836_v55 = vsel %vm628_vm3, %v549_v54, 0 }
  0x11   : > { %1569 = vmatpush3.bf16.msra.mxu1 %v1688_v2 }
  0x12   : > { %1574 = vmatprep.subr.bf16.mxu1 %v1725_v1 }
  0x14   : > { %1571 = vmatmul.mubr.msk.bf16.vlgmr.msra.gmra.mxu1 %vm504_vm1, %v480_v4 }
  0x15   : > { %1576 = vmatprep.mubr.msk.bf16.mxu1 %vm1726_vm0, %v1725_v1 }
  0xd4   : > { %v542_v6 = vpop.f32.mrf.mxu1 }
  0xd5   : > { %v543_v7 = vadd.f32 %v1497_v5, %v542_v6 }
  0xd6   : > { %v1572_v8 = vpop.f32.mrf.mxu1 }
  0xd7   : > { %v1853_v9 = vpack.c.bf16 %v543_v7, %v543_v7 }
  0xd8   : > { %v545_v10 = vpop.f32.mrf.mxu1 }
  0xd9   : > { %673 = vrot.lane.b32.xlu1 %v1853_v9, %s1727_s25  ;;  %554 = vrot.lane.b32.xlu0 %v1853_v9, %s1728_s26  ;;  %s1734_s26 = smov 72  }
  0xda   : > { %v1573_v11 = vpop.f32.mrf.mxu1 }
  0xdd   : > { %675 = vrot.lane.b32.xlu0 %v1853_v9, %s1729_s27  ;;  %s1735_s27 = smov 104  }
 0x14b   : > { %v555_v12 = vpop.permute.xlu0 %554  ;;  %v674_v16 = vpop.permute.xlu1 %673 }
 0x14c   : > { %v561_v13 = vsel %vm556_vm2, %v555_v12, 0 }
 0x14d   : > { %1575 = vmatpush3.bf16.xpose.msra.mxu1 %v561_v13 }
 0x14e   : > { %1586 = vmatprep.subr.bf16.mxu1 %v1725_v1 }
 0x14f   : > { %v676_v14 = vpop.permute.xlu0 %675 }
 0x150   : > { %v681_v15 = vsel %vm556_vm2, %v676_v14, 0 }
 0x154   : > { %1577 = vmatmul.mubr.msk.bf16.vlgmr.msra.gmra.mxu1 %vm556_vm2, %v1853_v9 }
 0x155   : > { %1587 = vmatpush3.bf16.xpose.msra.mxu1 %v681_v15  ;;  %1588 = vmatprep.mubr.msk.bf16.mxu1 %vm1726_vm0, %v1725_v1 }
 0x156   : > { %1598 = vmatprep.subr.bf16.mxu1 %v1725_v1 }
 0x15c   : > { %1589 = vmatmul.mubr.msk.bf16.vlgmr.msra.gmra.mxu1 %vm556_vm2, %v674_v16 }
 0x15d   : > { %1600 = vmatprep.mubr.msk.bf16.mxu1 %vm1726_vm0, %v1725_v1  ;;  %1599 = vmatpush3.bf16.msra.mxu1 %v790_v57 }
 0x15e   : > { %1610 = vmatprep.subr.bf16.mxu1 %v1725_v1 }
 0x214   : > { %v597_v17 = vpop.f32.mrf.mxu1 }
 0x215   : > { %v603_v19 = vmul.f32 0.35355338, %v597_v17 }
 0x216   : > { %v1578_v20 = vpop.f32.mrf.mxu1 }
 0x217   : > { %v610_v21 = vadd.f32 %v1873_v18, %v603_v19 }
 0x218   : > { %v600_v22 = vpop.f32.mrf.mxu1 }
 0x219   : > { %v611_v23 = vsel %vm556_vm2, %v610_v21, -inf }
 0x21a   : > { %612 = vmax.xlane.f32.xlu1 %v611_v23  ;;  %v1579_v24 = vpop.f32.mrf.mxu1 }
 0x21c   : > { %v717_v25 = vpop.f32.mrf.mxu1 }
 0x21d   : > { %v723_v26 = vmul.f32 0.35355338, %v717_v25 }
 0x21e   : > { %v1590_v27 = vpop.f32.mrf.mxu1 }
 0x21f   : > { %v724_v28 = vadd.f32 %v1873_v18, %v723_v26 }
 0x220   : > { %v720_v29 = vpop.f32.mrf.mxu1 }
 0x221   : > { %v725_v30 = vsel %vm556_vm2, %v724_v28, -inf }
 0x222   : > { %726 = vmax.xlane.f32.xlu0 %v725_v30  ;;  %v1591_v31 = vpop.f32.mrf.mxu1 }
 0x2a3   : > { %v613_v32 = vpop.xlane.xlu1 %612 }
 0x2a4   : > { %v614_v33 = vsub.f32 %v610_v21, %v613_v32 }
 0x2a6   : > { %v615_v34 = vmul.f32 1.442695, %v614_v33 }
 0x2a8   : > { %1695 = vpow2.f32 %v615_v34 }
 0x2ab   : > { %v727_v35 = vpop.xlane.xlu0 %726 }
 0x2ac   : > { %v728_v36 = vsub.f32 %v724_v28, %v727_v35 }
 0x2ae   : > { %v729_v37 = vmul.f32 1.442695, %v728_v36 }
 0x2b0   : > { %1697 = vpow2.f32 %v729_v37 }
 0x2b5   : > { %v1696_v38 = vpop.eup %1695 }
 0x2b6   : > { %v617_v39 = vsel %vm556_vm2, %v1696_v38, 0.0 }
 0x2b7   : > { %618 = vadd.xlane.f32.xlu0 %v617_v39 }
 0x2bd   : > { %v1698_v40 = vpop.eup %1697 }
 0x2be   : > { %v731_v41 = vsel %vm556_vm2, %v1698_v40, 0.0 }
 0x2bf   : > { %732 = vadd.xlane.f32.xlu1 %v731_v41  ;;  %v551_v41 = vld [vmem:[%s2022_s4 + $0x8] sm:$0xf] }
 0x2cd   : > { %623 = vrot.lane.b32.xlu0 %v1853_v9, %s1730_s17  ;;  %s1737_s17 = smov 40  }
 0x2d0   : > { %737 = vrot.lane.b32.xlu1 %v1853_v9, %s1731_s18 }
 0x2d1   : > { %878 = vrot.lane.b32.xlu0 %v1853_v9, %s1732_s20 }
 0x2d4   : > { %880 = vrot.lane.b32.xlu1 %v1853_v9, %s1733_s21 }
 0x340   : > { %v619_v42 = vpop.xlane.xlu0 %618 }
 0x341   : > { %1699 = vrcp.f32 %v619_v42  ;;  %v995_v42 = vsel %vm628_vm3, %v551_v41, 0  ;;  %v1691_v41 = vld [vmem:[%s2028_s10 + $0x18] sm:$0xff]  }
 0x344   : > { %v624_v43 = vpop.permute.xlu0 %623 }
 0x345   : > { %v630_v44 = vsel %vm628_vm3, %v624_v43, 0 }
 0x346   : > { %1581 = vmatpush3.bf16.msra.mxu0 %v630_v44 }
 0x347   : > { %1592 = vmatprep.subr.bf16.mxu0 %v1725_v1 }
 0x348   : > { %v733_v45 = vpop.xlane.xlu1 %732  ;;  %v879_v8 = vpop.permute.xlu0 %878 }
 0x349   : > { %1701 = vrcp.f32 %v733_v45 }
 0x34c   : > { %v738_v48 = vpop.permute.xlu1 %737 }
 0x34d   : > { %v743_v50 = vsel %vm628_vm3, %v738_v48, 0 }
 0x34e   : > { %v1700_v46 = vpop.eup %1699 }
 0x34f   : > { %v621_v47 = vmul.f32 %v1700_v46, %v1696_v38 }
 0x350   : > { %v881_v63 = vpop.permute.xlu1 %880 }
 0x351   : > { %v622_v49 = vpack.c.bf16 %v621_v47, %v621_v47  ;;  %v886_v5 = vsel %vm556_vm2, %v881_v63, 0 }
 0x353   : > { %1583 = vmatmul.mubr.msk.bf16.vlgmr.msra.gmra.mxu0 %vm556_vm2, %v622_v49 }
 0x354   : > { %1593 = vmatpush3.bf16.msra.mxu0 %v743_v50  ;;  %1594 = vmatprep.mubr.msk.bf16.mxu0 %vm1726_vm0, %v1725_v1 }
 0x355   : > { %1604 = vmatprep.subr.bf16.mxu0 %v1725_v1 }
 0x356   : > { %v1702_v51 = vpop.eup %1701 }
 0x357   : > { %v735_v52 = vmul.f32 %v1702_v51, %v1698_v40 }
 0x359   : > { %v736_v53 = vpack.c.bf16 %v735_v52, %v735_v52 }
 0x35b   : > { %1595 = vmatmul.mubr.msk.bf16.vlgmr.msra.gmra.mxu0 %vm556_vm2, %v736_v53 }
 0x35c   : > { %1606 = vmatprep.mubr.msk.bf16.mxu0 %vm1726_vm0, %v1725_v1  ;;  %1605 = vmatpush3.bf16.msra.mxu0 %v836_v55 }
 0x35d   : > { %1616 = vmatprep.subr.bf16.mxu0 %v1725_v1 }
 0x413   : > { %v666_v58 = vpop.f32.mrf.mxu0 }
 0x414   : > { %v672_v59 = vpack.c.bf16 %v666_v58, %v666_v58 }
 0x415   : > { %v1584_v60 = vpop.f32.mrf.mxu0 }
 0x416   : > { %1607 = vmatmul.mubr.msk.bf16.vlgmr.msra.gmra.mxu0 %vm556_vm2, %v672_v59 }
 0x417   : > { %v669_v61 = vpop.f32.mrf.mxu0  ;;  %1618 = vmatprep.mubr.msk.bf16.mxu0 %vm1726_vm0, %v1725_v1 }
 0x419   : > { %v1585_v62 = vpop.f32.mrf.mxu0 }
 0x41b   : > { %v779_v0 = vpop.f32.mrf.mxu0 }
 0x41c   : > { %v785_v2 = vpack.c.bf16 %v779_v0, %v779_v0 }
 0x41d   : > { %v1596_v4 = vpop.f32.mrf.mxu0 }
 0x41e   : > { %1601 = vmatmul.mubr.msk.bf16.vlgmr.msra.gmra.mxu1 %vm556_vm2, %v785_v2 }
 0x41f   : > { %1611 = vmatpush3.bf16.xpose.msra.mxu1 %v886_v5  ;;  %v782_v6 = vpop.f32.mrf.mxu0  ;;  %1612 = vmatprep.mubr.msk.bf16.mxu1 %vm1726_vm0, %v1725_v1 }
 0x420   : > { %1622 = vmatprep.subr.bf16.mxu1 %v1725_v1 }
 0x421   : > { %v1597_v7 = vpop.f32.mrf.mxu0 }
 0x426   : > { %1613 = vmatmul.mubr.msk.bf16.vlgmr.msra.gmra.mxu1 %vm556_vm2, %v879_v8 }
 0x427   : > { %1624 = vmatprep.mubr.msk.bf16.mxu1 %vm1726_vm0, %v1725_v1  ;;  %1623 = vmatpush3.bf16.msra.mxu1 %v995_v42  ;;  %v1692_v42 = vld [vmem:[%s2028_s10 + $0x10] sm:$0xff]  }
 0x428   : > { %1634 = vmatprep.subr.bf16.mxu1 %v1725_v1 }
 0x4d6   : > { %v872_v10 = vpop.f32.mrf.mxu0 }
 0x4d8   : > { %v1608_v11 = vpop.f32.mrf.mxu0 }
 0x4da   : > { %v875_v12 = vpop.f32.mrf.mxu0 }
 0x4dc   : > { %v1609_v13 = vpop.f32.mrf.mxu0 }
 0x4de   : > { %v826_v14 = vpop.f32.mrf.mxu1 }
 0x4df   : > { %v1916_v15 = vadd.f32 %v872_v10, %v826_v14 }
 0x4e0   : > { %v1602_v16 = vpop.f32.mrf.mxu1 }
 0x4e1   : > { %v1514_v16 = vld [vmem:[%s2023_s5] ss:$0 sm:$0xff] }
 0x4e2   : > { %v829_v17 = vpop.f32.mrf.mxu1 }
 0x4e4   : > { %v1603_v19 = vpop.f32.mrf.mxu1 }
 0x4e6   : > { %v922_v20 = vpop.f32.mrf.mxu1 }
 0x4e7   : > { %v928_v21 = vmul.f32 0.35355338, %v922_v20 }
 0x4e8   : > { %v1614_v22 = vpop.f32.mrf.mxu1 }
 0x4e9   : > { %v929_v23 = vadd.f32 %v1873_v18, %v928_v21 }
 0x4ea   : > { %v925_v24 = vpop.f32.mrf.mxu1 }
 0x4eb   : > { %v930_v25 = vsel %vm556_vm2, %v929_v23, -inf }
 0x4ec   : > { %931 = vmax.xlane.f32.xlu1 %v930_v25  ;;  %v1615_v26 = vpop.f32.mrf.mxu1 }
 0x4fd   : > { %1040 = vrot.lane.b32.xlu1 %v1853_v9, %s1734_s26 }
 0x501   : > { %1038 = vrot.lane.b32.xlu1 %v1853_v9, %s1735_s27 }
 0x575   : > { %v932_v27 = vpop.xlane.xlu1 %931 }
 0x576   : > { %v933_v28 = vsub.f32 %v929_v23, %v932_v27 }
 0x578   : > { %v934_v29 = vmul.f32 1.442695, %v933_v28 }
 0x579   : > { %v1041_v37 = vpop.permute.xlu1 %1040 }
 0x57a   : > { %1703 = vpow2.f32 %v934_v29  ;;  %v1046_v39 = vsel %vm556_vm2, %v1041_v37, 0  ;;  %v1516_v37 = vld [vmem:[%s2025_s7] ss:$0 sm:$0xff] }
 0x57d   : > { %v1039_v40 = vpop.permute.xlu1 %1038 }
 0x587   : > { %v1704_v30 = vpop.eup %1703 }
 0x588   : > { %v936_v31 = vsel %vm556_vm2, %v1704_v30, 0.0 }
 0x589   : > { %937 = vadd.xlane.f32.xlu0 %v936_v31 }
 0x59f   : > { %942 = vrot.lane.b32.xlu0 %v1853_v9, %s1736_s28 }
 0x612   : > { %v938_v32 = vpop.xlane.xlu0 %937 }
 0x613   : > { %1705 = vrcp.f32 %v938_v32 }
 0x616   : > { %v943_v33 = vpop.permute.xlu0 %942 }
 0x617   : > { %v948_v34 = vsel %vm628_vm3, %v943_v33, 0 }
 0x618   : > { %1617 = vmatpush3.bf16.msra.mxu0 %v948_v34 }
 0x619   : > { %1628 = vmatprep.subr.bf16.mxu0 %v1725_v1 }
 0x620   : > { %v1706_v35 = vpop.eup %1705 }
 0x621   : > { %v940_v36 = vmul.f32 %v1706_v35, %v1704_v30  ;;  %v1689_v30 = vld [vmem:[%s2026_s8 + $0x8] sm:$0xff]   ;;  %v1515_v35 = vld [vmem:[%s2024_s6] ss:$0 sm:$0xff] }
 0x623   : > { %v941_v38 = vpack.c.bf16 %v940_v36, %v940_v36 }
 0x625   : > { %1619 = vmatmul.mubr.msk.bf16.vlgmr.msra.gmra.mxu0 %vm556_vm2, %v941_v38 }
 0x626   : > { %1629 = vmatpush3.bf16.xpose.msra.mxu0 %v1046_v39  ;;  %1630 = vmatprep.mubr.msk.bf16.mxu0 %vm1726_vm0, %v1725_v1 }
 0x627   : > { %1640 = vmatprep.subr.bf16.mxu0 %v1725_v1 }
 0x62d   : > { %1631 = vmatmul.mubr.msk.bf16.vlgmr.msra.gmra.mxu0 %vm556_vm2, %v1039_v40 }
 0x62e   : > { %1642 = vmatprep.mubr.msk.bf16.mxu0 %vm1726_vm0, %v1725_v1 }
 0x6e5   : > { %v984_v43 = vpop.f32.mrf.mxu0 }
 0x6e6   : > { %v990_v44 = vpack.c.bf16 %v984_v43, %v984_v43  ;;  %v1693_v43 = vld [vmem:[%s2028_s10 + $0x8] sm:$0xff]  }
 0x6e7   : > { %v1620_v45 = vpop.f32.mrf.mxu0 }
 0x6e8   : > { %1625 = vmatmul.mubr.msk.bf16.vlgmr.msra.gmra.mxu1 %vm556_vm2, %v990_v44  ;;  %v1694_v44 = vld [vmem:[%s2028_s10] sm:$0xff]  }
 0x6e9   : > { %v987_v46 = vpop.f32.mrf.mxu0  ;;  %1636 = vmatprep.mubr.msk.bf16.mxu1 %vm1726_vm0, %v1725_v1  ;;  %v1517_v45 = vld [vmem:[%s2027_s9] ss:$0 sm:$0xff] }
 0x6eb   : > { %v1621_v47 = vpop.f32.mrf.mxu0 }
 0x6ed   : > { %v1082_v48 = vpop.f32.mrf.mxu0 }
 0x6ee   : > { %v1088_v49 = vmul.f32 0.35355338, %v1082_v48 }
 0x6ef   : > { %v1632_v50 = vpop.f32.mrf.mxu0 }
 0x6f0   : > { %v1089_v51 = vadd.f32 %v1873_v18, %v1088_v49 }
 0x6f1   : > { %v1085_v52 = vpop.f32.mrf.mxu0 }
 0x6f2   : > { %v1090_v53 = vsel %vm556_vm2, %v1089_v51, -inf }
 0x6f3   : > { %1091 = vmax.xlane.f32.xlu0 %v1090_v53  ;;  %v1633_v54 = vpop.f32.mrf.mxu0 }
 0x709   : > { %1102 = vrot.lane.b32.xlu0 %v1853_v9, %s1737_s17  ;;  %v552_v9 = vld [vmem:[%s2022_s4 + $0xc] sm:$0xf] }
 0x70a   : > { %v1155_v2 = vsel %vm628_vm3, %v552_v9, 0 }
 0x70b   : > { %1641 = vmatpush3.bf16.msra.mxu0 %v1155_v2 }
 0x70c   : > { %1654 = vmatprep.subr.bf16.mxu0 %v1725_v1 }
 0x77c   : > { %v1092_v55 = vpop.xlane.xlu0 %1091 }
 0x77d   : > { %v1093_v56 = vsub.f32 %v1089_v51, %v1092_v55 }
 0x77f   : > { %v1094_v57 = vmul.f32 1.442695, %v1093_v56 }
 0x780   : > { %v1103_v58 = vpop.permute.xlu0 %1102 }
 0x781   : > { %1707 = vpow2.f32 %v1094_v57  ;;  %v1108_v59 = vsel %vm628_vm3, %v1103_v58, 0 }
 0x782   : > { %1635 = vmatpush3.bf16.msra.mxu1 %v1108_v59 }
 0x783   : > { %1646 = vmatprep.subr.bf16.mxu1 %v1725_v1 }
 0x78e   : > { %v1708_v60 = vpop.eup %1707 }
 0x78f   : > { %v1096_v18 = vsel %vm556_vm2, %v1708_v60, 0.0 }
 0x790   : > { %1097 = vadd.xlane.f32.xlu1 %v1096_v18 }
 0x7a8   : > { %v1031_v61 = vpop.f32.mrf.mxu1 }
 0x7a9   : > { %v1037_v62 = vadd.f32 %v1031_v61, %v1916_v15 }
 0x7aa   : > { %v1626_v63 = vpop.f32.mrf.mxu1 }
 0x7ac   : > { %v1034_v0 = vpop.f32.mrf.mxu1 }
 0x7ae   : > { %v1627_v4 = vpop.f32.mrf.mxu1 }
 0x819   : > { %v1098_v5 = vpop.xlane.xlu1 %1097 }
 0x81a   : > { %1709 = vrcp.f32 %v1098_v5 }
 0x827   : > { %v1710_v6 = vpop.eup %1709 }
 0x828   : > { %v1100_v7 = vmul.f32 %v1710_v6, %v1708_v60  ;;  %v1521_v60 = vld [vmem:[%s2029_s11] ss:$0 sm:$0xff] }
 0x82a   : > { %v1101_v8 = vpack.c.bf16 %v1100_v7, %v1100_v7 }
 0x82c   : > { %1637 = vmatmul.mubr.msk.bf16.vlgmr.msra.gmra.mxu1 %vm556_vm2, %v1101_v8 }
 0x82d   : > { %1650 = vmatprep.mubr.msk.bf16.mxu1 %vm1726_vm0, %v1725_v1  ;;  %1647 = vmatpush3.bf16.msra.mxu1 %v1689_v30 }
 0x82e   : > { %1648 = vmatprep.subr.bf16.mxu1 %v1725_v1 }
 0x8ec   : > { %v1144_v10 = vpop.f32.mrf.mxu1 }
 0x8ed   : > { %v1150_v11 = vpack.c.bf16 %v1144_v10, %v1144_v10 }
 0x8ee   : > { %v1638_v12 = vpop.f32.mrf.mxu1 }
 0x8ef   : > { %1643 = vmatmul.mubr.msk.bf16.vlgmr.msra.gmra.mxu0 %vm556_vm2, %v1150_v11 }
 0x8f0   : > { %v1147_v13 = vpop.f32.mrf.mxu1  ;;  %1662 = vmatprep.mubr.msk.bf16.mxu0 %vm1726_vm0, %v1725_v1  ;;  %1655 = vmatpush3.bf16.msra.mxu0 %v1691_v41 }
 0x8f1   : > { %1656 = vmatprep.subr.bf16.mxu0 %v1725_v1 }
 0x8f2   : > { %v1639_v14 = vpop.f32.mrf.mxu1 }
 0x8f3   : > { %v1527_v14 = vld [vmem:[%s2030_s12] ss:$0 sm:$0xff] }
 0x8f4   : > { %1657 = vmatpush3.bf16.msra.mxu0 %v1692_v42 }
 0x8f5   : > { %1658 = vmatprep.subr.bf16.mxu0 %v1725_v1 }
 0x8f8   : > { %1659 = vmatpush3.bf16.msra.mxu0 %v1693_v43 }
 0x8f9   : > { %1660 = vmatprep.subr.bf16.mxu0 %v1725_v1 }
 0x8fc   : > { %1661 = vmatpush3.bf16.msra.mxu0 %v1694_v44 }
 0x9af   : > { %v1191_v15 = vpop.f32.mrf.mxu0 }
 0x9b0   : > { %v1197_v17 = vadd.f32 %v1191_v15, %v1037_v62 }
 0x9b1   : > { %v1644_v19 = vpop.f32.mrf.mxu0 }
 0x9b2   : > { %v1205_v20 = vadd.f32 %v1514_v16, %v1197_v17  ;;  %v1528_v16 = vld [vmem:[%s2031_s13] ss:$0 sm:$0xff] }
 0x9b3   : > { %v1194_v21 = vpop.f32.mrf.mxu0 }
 0x9b4   : > { %v1206_v22 = vadd.f32 %v1205_v20, %v1843_v3  ;;  %v1690_v3 = vld [vmem:[%s2026_s8] sm:$0xff]  }
 0x9b5   : > { %v1645_v23 = vpop.f32.mrf.mxu0  ;;  %1649 = vmatpush3.bf16.msra.mxu1 %v1690_v3 }
 0x9b6   : > { %v1209_v24 = vsel %vm504_vm1, %v1206_v22, 0.0 }
 0x9b7   : > { %1210 = vadd.xlane.f32.xlu1 %v1209_v24 }
 0xa40   : > { %v1211_v25 = vpop.xlane.xlu1 %1210 }
 0xa41   : > { %v1213_v26 = vmul.f32 0.03125, %v1211_v25 }
 0xa43   : > { %v1214_v27 = vsub.f32 %v1206_v22, %v1213_v26 }
 0xa45   : > { %v1215_v28 = vmul.f32 %v1214_v27, %v1214_v27 }
 0xa47   : > { %v1216_v29 = vsel %vm504_vm1, %v1215_v28, 0.0 }
 0xa48   : > { %1217 = vadd.xlane.f32.xlu1 %v1216_v29 }
 0xad1   : > { %v1218_v31 = vpop.xlane.xlu1 %1217 }
 0xad2   : > { %v1219_v32 = vmul.f32 0.03125, %v1218_v31 }
 0xad4   : > { %v1220_v33 = vadd.f32 1e-05, %v1219_v32 }
 0xad6   : > { %1711 = vrsqrt.f32 %v1220_v33 }
 0xae3   : > { %v1712_v34 = vpop.eup %1711 }
 0xae4   : > { %v1222_v36 = vmul.f32 %v1712_v34, %v1214_v27 }
 0xae6   : > { %v1229_v38 = vmul.f32 %v1515_v35, %v1222_v36 }
 0xae8   : > { %v1236_v39 = vadd.f32 %v1516_v37, %v1229_v38 }
 0xaea   : > { %v1237_v40 = vpack.c.bf16 %v1236_v39, %v1236_v39 }
 0xaec   : > { %1651 = vmatmul.mubr.msk.bf16.vlgmr.msra.gmra.mxu1 %vm504_vm1, %v1237_v40 }
 0xbac   : > { %v1298_v46 = vpop.f32.mrf.mxu1 }
 0xbad   : > { %v1299_v47 = vadd.f32 %v1517_v45, %v1298_v46 }
 0xbae   : > { %v1652_v48 = vpop.f32.mrf.mxu1 }
 0xbaf   : > { %v1305_v49 = vmul.f32 0.044715, %v1299_v47  ;;  %v1304_v57 = vmul.f32 0.5, %v1299_v47 }
 0xbb0   : > { %v1301_v50 = vpop.f32.mrf.mxu1 }
 0xbb1   : > { %v1306_v51 = vmul.f32 %v1305_v49, %v1299_v47 }
 0xbb2   : > { %v1653_v52 = vpop.f32.mrf.mxu1 }
 0xbb3   : > { %v1307_v53 = vmul.f32 %v1306_v51, %v1299_v47 }
 0xbb5   : > { %v1308_v54 = vadd.f32 %v1307_v53, %v1299_v47 }
 0xbb7   : > { %v1309_v55 = vmul.f32 0.7978846, %v1308_v54 }
 0xbb9   : > { %1713 = vtanh.f32 %v1309_v55 }
 0xbc6   : > { %v1714_v56 = vpop.eup %1713 }
 0xbc7   : > { %v1311_v58 = vadd.f32 1.0, %v1714_v56 }
 0xbc9   : > { %v1312_v1 = vmul.f32 %v1311_v58, %v1304_v57 }
 0xbcb   : > { %v1313_v59 = vpack.c.bf16 %v1312_v1, %v1312_v1 }
 0xbcd   : > { %1663 = vmatmul.mubr.msk.bf16.vlgmr.msra.gmra.mxu0 %vm1353_vm4, %v1313_v59 }
 0xc8d   : > { %v1391_v18 = vpop.f32.mrf.mxu0 }
 0xc8e   : > { %v1392_v61 = vadd.f32 %v1521_v60, %v1391_v18 }
 0xc8f   : > { %v1664_v62 = vpop.f32.mrf.mxu0 }
 0xc90   : > { %v1397_v63 = vadd.f32 %v1392_v61, %v1236_v39 }
 0xc91   : > { %v1394_v0 = vpop.f32.mrf.mxu0 }
 0xc92   : > { %v1400_v9 = vsel %vm504_vm1, %v1397_v63, 0.0 }
 0xc93   : > { %1401 = vadd.xlane.f32.xlu1 %v1400_v9  ;;  %v1665_v2 = vpop.f32.mrf.mxu0 }
 0xd1c   : > { %v1402_v4 = vpop.xlane.xlu1 %1401 }
 0xd1d   : > { %v1403_v5 = vmul.f32 0.03125, %v1402_v4 }
 0xd1f   : > { %v1404_v6 = vsub.f32 %v1397_v63, %v1403_v5 }
 0xd21   : > { %v1405_v7 = vmul.f32 %v1404_v6, %v1404_v6 }
 0xd23   : > { %v1406_v8 = vsel %vm504_vm1, %v1405_v7, 0.0 }
 0xd24   : > { %1407 = vadd.xlane.f32.xlu1 %v1406_v8 }
 0xdad   : > { %v1408_v10 = vpop.xlane.xlu1 %1407 }
 0xdae   : > { %v1409_v11 = vmul.f32 0.03125, %v1408_v10 }
 0xdb0   : > { %v1410_v12 = vadd.f32 1e-05, %v1409_v11 }
 0xdb2   : > { %1715 = vrsqrt.f32 %v1410_v12 }
 0xdbf   : > { %v1716_v13 = vpop.eup %1715 }
 0xdc0   : > { %v1412_v15 = vmul.f32 %v1716_v13, %v1404_v6 }
 0xdc2   : > { %v1419_v17 = vmul.f32 %v1527_v14, %v1412_v15 }
 0xdc4   : > { %v1426_v19 = vadd.f32 %v1528_v16, %v1419_v17 }
 0xdc6   : > { %1427 = vst.msk [vmem:[%s476_s23] sm:$0xff] %vm504_vm1, %v1426_v19 }
 0xdc7 PF: > { %s24_s29 = sadd.s32 1, %s1723_s29  }
 0xdc8   : > { %p21_p4 = scmp.ge.s32.totalorder %s24_s29, 4  }
 0xdca   :  { %23 = sbr.rel (!%p21_p4) target bundleno = 1 (0x1), region = 109 }

</bundles_post_ra>
